<compile_context>
chip_gen: v7x
topology: tpu7x:2x2x1
jax: 0.10.0
libtpu: 0.0.40
codegen_flags: <defaults>
</compile_context>

<pallas_src>
import jax
import jax.numpy as jnp
from jax.experimental import pallas as pl
from jax.experimental.pallas import tpu as pltpu


def _nnloss_kernel(pred_ref, gts_ref, out_ref):
    # pred_ref: (BB, C, HW)        predicted, lane-dense on HW
    # gts_ref:  (BB, S, C, HW)     precomputed shifted ground-truth views
    # out_ref:  (1, BB, HW)        per-block min-over-shifts L1 map
    pred = pred_ref[...].astype(jnp.float32)              # cast once
    gts = gts_ref[...].astype(jnp.float32)                # cast once

    diff = jnp.abs(gts - pred[:, None, :, :])             # (BB, S, C, HW)  VPU
    norms = jnp.sum(diff, axis=2)                         # (BB, S, HW)  sum over C
    min_norm = jnp.min(norms, axis=1)                     # (BB, HW)     min over shifts
    out_ref[...] = min_norm[None]                         # lane-dense store


def nn_loss(predicted, ground_truth, nh=5, nw=5,
            vmem_block_budget_bytes=8 * 1024 * 1024):
    """Pallas equivalent of NNLoss.forward (NCHW inputs)."""
    B, C, H, W = predicted.shape
    assert ground_truth.shape == (B, C, H, W)

    # Mirror ConstantPad2d((v_pad, v_pad, h_pad, h_pad), -10000):
    # (left, right, top, bottom) -> W padded by v_pad = nh//2, H padded by h_pad = nw//2.
    v_pad = nh // 2
    h_pad = nw // 2
    gt_pad = jnp.pad(
        ground_truth,
        ((0, 0), (0, 0), (h_pad, h_pad), (v_pad, v_pad)),
        mode="constant",
        constant_values=-10000.0,
    )
    Hp, Wp = H + 2 * h_pad, W + 2 * v_pad
    # The original module only broadcasts correctly when the shifted windows
    # match the predicted spatial size (true for the default nh == nw).
    assert (Hp - nh + 1, Wp - nw + 1) == (H, W), \
        "NNLoss (like the PyTorch original) requires nh == nw."

    S = nh * nw
    HW = H * W

    # Lane-densify in the wrapper: stack the S shifted views once (cheap XLA
    # slices), flatten spatial dims so the lane axis is H*W (multiple of 128
    # for the shapes of interest; otherwise full-array blocks keep it legal).
    shifted = [gt_pad[:, :, i:i + H, j:j + W]
               for i in range(nh) for j in range(nw)]
    gts = jnp.stack(shifted, axis=1).reshape(B, S, C, HW)   # (B, S, C, HW)
    pred = predicted.reshape(B, C, HW)                      # (B, C, HW)

    # Choose the batch chunk BB: largest divisor of B whose (double-buffered,
    # f32) blocks stay within a conservative per-block VMEM budget -- safe for
    # v7x's smaller VMEM as well as v5e/v6e.
    bytes_per_sample = (S * C * HW + C * HW + HW) * 4 * 2
    bb = 1
    for cand in range(1, B + 1):
        if B % cand == 0 and cand * bytes_per_sample <= vmem_block_budget_bytes:
            bb = cand
    grid = B // bb

    partial = pl.pallas_call(
        _nnloss_kernel,
        out_shape=jax.ShapeDtypeStruct((grid, bb, HW), jnp.float32),
        grid_spec=pltpu.PrefetchScalarGridSpec(
            num_scalar_prefetch=0,
            grid=(grid,),
            in_specs=[
                pl.BlockSpec((bb, C, HW), lambda g: (g, 0, 0)),
                pl.BlockSpec((bb, S, C, HW), lambda g: (g, 0, 0, 0)),
            ],
            out_specs=pl.BlockSpec((1, bb, HW), lambda g: (g, 0, 0)),
        ),
        compiler_params=pltpu.CompilerParams(
            # Per-block partial outputs -> no shared accumulator -> the batch
            # axis can be sharded across TensorCores (v7x).
            dimension_semantics=("parallel",),
        ),
    )(pred, gts)

    # Final mean over (B, H, W) done in the wrapper: partial holds exactly
    # B*H*W min-norm values.
    return jnp.mean(partial)


def _reference_nn_loss(predicted, ground_truth, nh=5, nw=5):
    # Pure-JAX reference mirroring the PyTorch code (sanity check).
    v_pad = nh // 2
    h_pad = nw // 2
    gt_pad = jnp.pad(
        ground_truth,
        ((0, 0), (0, 0), (h_pad, h_pad), (v_pad, v_pad)),
        constant_values=-10000.0,
    )
    B, C, H, W = predicted.shape
    refs = []
    for i in range(nh):
        for j in range(nw):
            refs.append(gt_pad[:, :, i:i + H, j:j + W][..., None])
    reference = jnp.concatenate(refs, axis=-1)
    absd = jnp.abs(reference - predicted[..., None])
    norms = jnp.sum(absd, axis=1)
    loss = jnp.min(norms, axis=-1)
    return jnp.mean(loss)


if __name__ == "__main__":
    key = jax.random.PRNGKey(0)
    k1, k2 = jax.random.split(key)
    B, C, H, W = 2, 4, 16, 16
    predicted = jax.random.normal(k1, (B, C, H, W), dtype=jnp.float32)
    ground_truth = jax.random.normal(k2, (B, C, H, W), dtype=jnp.float32)

    loss = nn_loss(predicted, ground_truth)
    loss = jax.block_until_ready(loss)

    ref = _reference_nn_loss(predicted, ground_truth)
    assert jnp.allclose(loss, ref, rtol=1e-5, atol=1e-5), (loss, ref)

    print("KERNEL_OK")
</pallas_src>

<mosaic_0001>
module attributes {stable_mosaic.version = 11 : i64} {
  func.func @_nnloss_kernel(%arg0: i32, %arg1: memref<2x4x256xf32, #tpu.memory_space<vmem>>, %arg2: memref<2x25x4x256xf32, #tpu.memory_space<vmem>>, %arg3: memref<1x2x256xf32, #tpu.memory_space<vmem>>) attributes {dimension_semantics = [#tpu.dimension_semantics<parallel>], iteration_bounds = array<i64: 1>, scalar_prefetch = 0 : i64, scratch_operands = 0 : i64, tpu.core_type = #tpu.core_type<tc>, window_params = [{transform_indices = @transform_0, window_bounds = array<i64: 2, 4, 256>}, {transform_indices = @transform_1, window_bounds = array<i64: 2, 25, 4, 256>}, {transform_indices = @transform_2, window_bounds = array<i64: 1, 2, 256>}]} {
    %c0 = arith.constant 0 : index
    %c0_0 = arith.constant 0 : index
    %c0_1 = arith.constant 0 : index
    %0 = vector.load %arg1[%c0, %c0_0, %c0_1] : memref<2x4x256xf32, #tpu.memory_space<vmem>>, vector<2x4x256xf32>
    %c0_2 = arith.constant 0 : index
    %c0_3 = arith.constant 0 : index
    %c0_4 = arith.constant 0 : index
    %c0_5 = arith.constant 0 : index
    %1 = vector.load %arg2[%c0_2, %c0_3, %c0_4, %c0_5] : memref<2x25x4x256xf32, #tpu.memory_space<vmem>>, vector<2x25x4x256xf32>
    %2 = vector.shape_cast %0 : vector<2x4x256xf32> to vector<2x1x4x256xf32>
    %3 = vector.broadcast %2 : vector<2x1x4x256xf32> to vector<2x25x4x256xf32>
    %4 = arith.subf %1, %3 : vector<2x25x4x256xf32>
    %5 = math.absf %4 : vector<2x25x4x256xf32>
    %cst = arith.constant dense<0.000000e+00> : vector<2x25x256xf32>
    %6 = vector.multi_reduction <add>, %5, %cst [2] : vector<2x25x4x256xf32> to vector<2x25x256xf32>
    %cst_6 = arith.constant dense<0x7F800000> : vector<2x256xf32>
    %7 = vector.multi_reduction <minimumf>, %6, %cst_6 [1] : vector<2x25x256xf32> to vector<2x256xf32>
    %8 = vector.shape_cast %7 : vector<2x256xf32> to vector<1x2x256xf32>
    %c0_7 = arith.constant 0 : index
    %c0_8 = arith.constant 0 : index
    %c0_9 = arith.constant 0 : index
    %9 = vector.load %arg3[%c0_7, %c0_8, %c0_9] : memref<1x2x256xf32, #tpu.memory_space<vmem>>, vector<1x2x256xf32>
    tpu.vector_store %arg3[%c0_7, %c0_8, %c0_9], %8 {strides = array<i32>} : memref<1x2x256xf32, #tpu.memory_space<vmem>>, vector<1x2x256xf32>,
    return
  }
  func.func @transform_0(%arg0: i32) -> (i32, i32, i32) {
    %c0_i32 = arith.constant 0 : i32
    %c0_i32_0 = arith.constant 0 : i32
    %c0_i32_1 = arith.constant 0 : i32
    return %arg0, %c0_i32, %c0_i32_0 : i32, i32, i32
  }
  func.func @transform_1(%arg0: i32) -> (i32, i32, i32, i32) {
    %c0_i32 = arith.constant 0 : i32
    %c0_i32_0 = arith.constant 0 : i32
    %c0_i32_1 = arith.constant 0 : i32
    %c0_i32_2 = arith.constant 0 : i32
    return %arg0, %c0_i32, %c0_i32_0, %c0_i32_1 : i32, i32, i32, i32
  }
  func.func @transform_2(%arg0: i32) -> (i32, i32, i32) {
    %c0_i32 = arith.constant 0 : i32
    %c0_i32_0 = arith.constant 0 : i32
    %c0_i32_1 = arith.constant 0 : i32
    return %arg0, %c0_i32, %c0_i32_0 : i32, i32, i32
  }
}

</mosaic_0001>

<bundles_post_ra>
// kernel: tpu_custom_call.1
= control target key start
LH: loop header
LB: loop body
LE: loop exit
PB: predicated region body
PF: predicated region fallthrough
CT: control target
= control target key end

     0   :  { %7 = vsyncpa [#allocation3], 0  ;;  %s2100_s0 = inlined_call_operand.hbm [shape: f32[2,4,256], index: 0, kind: input, shape index: {}]   ;;  %s2101_s1 = inlined_call_operand.hbm [shape: f32[2,25,4,256], index: 1, kind: input, shape index: {}]   ;;  %s2102_s2 = inlined_call_operand.hbm [shape: f32[1,2,256], index: 2, kind: output, shape index: {}]  }
   0x1   :  { %8 = vsyncpa [#allocation6], 0 }
   0x2   :  { %9 = vsyncpa [#allocation4], 0  ;;  %s1268_s9 = smov [#allocation2]   ;;  %s1196_s13 = scalar_lea.hbm %s2100_s0, 256 }
   0x3   :  { %s15_s10 = sshll.u32 %s1268_s9, 4  ;;  %p1197_p0 = scmp.ne.s32.totalorder %s2100_s0, %s1196_s13  ;;  %s16_s10 = int_to_ptr.vmem [resolvable:$true] %s15_s10 }
   0x4   :  { %p1200_p1 = scmp.lt.u32.totalorder %s1196_s13, %s2100_s0 }
   0x6   :  { %p1202_p2 = pnand %p1200_p1, %p1197_p0 }
   0x8   :  { %1205 = shalt.err (!%p1202_p2)
}
   0x9   :  { %s1206_s18 = scalar_lea.vmem %s16_s10, 256  ;;  %p1211_p4 = scmp.lt.s32.totalorder %s16_s10, %s16_s10 }
   0xa   :  { %p1207_p3 = scmp.ne.s32.totalorder %s16_s10, %s1206_s18  ;;  %p1212_p5 = scmp.lt.s32.totalorder %s1206_s18, %s1206_s18 }
   0xc   :  { %p1213_p6 = por %p1212_p5, %p1211_p4 }
   0xe   :  { %p1214_p7 = pnand %p1213_p6, %p1207_p3 }
  0x10   :  { %1217 = shalt.err (!%p1214_p7)
}
  0x11   :  { %s1269_s19 = smov 128   ;;  %s1270_s20 = smov 8  }
  0x12   :  { %21 = dma.hbm_to_vmem [thread:$0]  %s2100_s0, 256, %s16_s10, [#allocation3], %s1269_s19, %s1269_s19, %s1270_s20  }
  0x13   :  { %s1271_s23 = smov [#allocation5]   ;;  %s1218_s27 = scalar_lea.hbm %s2101_s1, 6400 }
  0x14   :  { %s27_s24 = sshll.u32 %s1271_s23, 4  ;;  %p1219_p8 = scmp.ne.s32.totalorder %s2101_s1, %s1218_s27  ;;  %s28_s24 = int_to_ptr.vmem [resolvable:$true] %s27_s24 }
  0x15   :  { %p1222_p9 = scmp.lt.u32.totalorder %s1218_s27, %s2101_s1 }
  0x17   :  { %p1224_p10 = pnand %p1222_p9, %p1219_p8 }
  0x19   :  { %1227 = shalt.err (!%p1224_p10)
}
  0x1a   :  { %s1228_s4 = scalar_lea.vmem %s28_s24, 6400  ;;  %p1233_p12 = scmp.lt.s32.totalorder %s28_s24, %s28_s24 }
  0x1b   :  { %p1229_p11 = scmp.ne.s32.totalorder %s28_s24, %s1228_s4  ;;  %p1234_p13 = scmp.lt.s32.totalorder %s1228_s4, %s1228_s4 }
  0x1d   :  { %p1235_p0 = por %p1234_p13, %p1233_p12 }
  0x1f   :  { %p1236_p1 = pnand %p1235_p0, %p1229_p11 }
  0x21   :  { %1239 = shalt.err (!%p1236_p1)
}
  0x22   :  { %33 = dma.hbm_to_vmem [thread:$0]  %s2101_s1, 6400, %s28_s24, [#allocation6], %s1269_s19, %s1269_s19, %s1270_s20  }
  0x23   :  { %1262 = dma.done.wait [#allocation3], 256  }
  0x24   :  { %1263 = vsyncadd [#allocation3], 4294967040 }
  0x25   :  { %1264 = dma.done.wait [#allocation6], 6400  }
  0x26   :  { %1265 = vsyncadd [#allocation6], 4294960896  ;;  %v1313_v0 = vld [vmem:[#allocation2] sm:$0xff]  ;;  %v42_v1 = vld [vmem:[#allocation5] sm:$0xff]  ;;  %vm342_vm0 = vcmask 1043456   ;;  %vm1164_vm1 = vcmask 1041409  }
  0x27   :  { %v43_v2 = vld [vmem:[#allocation5 + $0x8] sm:$0xff]  ;;  %v44_v3 = vld [vmem:[#allocation5 + $0x10] sm:$0xff]  ;;  %v45_v4 = vld [vmem:[#allocation5 + $0x18] sm:$0xff]  ;;  %v92_v5 = vsub.f32 %v42_v1, %v1313_v0  ;;  %vm1166_vm2 = vcmask 1043459   ;;  %vm1168_vm3 = vcmask 1045509   ;;  %s1273_s1 = smov [#allocation7]  }
  0x28   :  { %v46_v6 = vld [vmem:[#allocation5 + $0x20] sm:$0xff]  ;;  %v47_v7 = vld [vmem:[#allocation5 + $0x28] sm:$0xff]  ;;  %v48_v8 = vld [vmem:[#allocation5 + $0x30] sm:$0xff]  ;;  %v93_v9 = vsub.f32 %v43_v2, %v1313_v0  ;;  %v94_v13 = vsub.f32 %v44_v3, %v1313_v0  ;;  %v95_v17 = vsub.f32 %v45_v4, %v1313_v0  ;;  %s1180_s6 = sshll.u32 %s1273_s1, 4  ;;  %vm1170_vm4 = vcmask 1047559   ;;  %s1181_s6 = int_to_ptr.vmem [resolvable:$true] %s1180_s6 }
  0x29   :  { %v1317_v10 = vld [vmem:[#allocation5 + $0x38] sm:$0xff]  ;;  %v1319_v11 = vld [vmem:[#allocation5 + $0x40] sm:$0xff]  ;;  %v1321_v12 = vld [vmem:[#allocation5 + $0x48] sm:$0xff]  ;;  %v96_v18 = vsub.f32 %v46_v6, %v1313_v0  ;;  %v97_v22 = vsub.f32 %v47_v7, %v1313_v0  ;;  %v98_v23 = vsub.f32 %v48_v8, %v1313_v0  ;;  %v1342_v25 = vand.u32 2147483647, %v92_v5  ;;  %s1240_s7 = scalar_lea.vmem %s1181_s6, 64  ;;  %p1245_p3 = scmp.lt.s32.totalorder %s1181_s6, %s1181_s6 }
  0x2a   :  { %v1324_v14 = vld [vmem:[#allocation5 + $0x50] sm:$0xff]  ;;  %v1326_v15 = vld [vmem:[#allocation5 + $0x58] sm:$0xff]  ;;  %v1328_v16 = vld [vmem:[#allocation5 + $0x60] sm:$0xff]  ;;  %v99_v24 = vsub.f32 %v1317_v10, %v1313_v0  ;;  %v100_v29 = vsub.f32 %v1319_v11, %v1313_v0  ;;  %v101_v30 = vsub.f32 %v1321_v12, %v1313_v0  ;;  %v1356_v32 = vand.u32 2147483647, %v93_v9  ;;  %p1241_p2 = scmp.ne.s32.totalorder %s1181_s6, %s1240_s7  ;;  %p1246_p4 = scmp.lt.s32.totalorder %s1240_s7, %s1240_s7 }
  0x2b   :  { %v1332_v19 = vld [vmem:[#allocation5 + $0x68] sm:$0xff]  ;;  %v1334_v20 = vld [vmem:[#allocation5 + $0x70] sm:$0xff]  ;;  %v1336_v21 = vld [vmem:[#allocation5 + $0x78] sm:$0xff]  ;;  %v102_v31 = vsub.f32 %v1324_v14, %v1313_v0  ;;  %v103_v37 = vsub.f32 %v1326_v15, %v1313_v0  ;;  %v104_v38 = vsub.f32 %v1328_v16, %v1313_v0  ;;  %v1372_v40 = vand.u32 2147483647, %v94_v13 }
  0x2c   :  { %v1344_v26 = vld [vmem:[#allocation5 + $0x80] sm:$0xff]  ;;  %v1346_v27 = vld [vmem:[#allocation5 + $0x88] sm:$0xff]  ;;  %v1348_v28 = vld [vmem:[#allocation5 + $0x90] sm:$0xff]  ;;  %v105_v39 = vsub.f32 %v1332_v19, %v1313_v0  ;;  %v106_v44 = vsub.f32 %v1334_v20, %v1313_v0  ;;  %v107_v45 = vsub.f32 %v1336_v21, %v1313_v0  ;;  %v1386_v47 = vand.u32 2147483647, %v95_v17  ;;  %p1247_p5 = por %p1246_p4, %p1245_p3 }
  0x2d   :  { %v1358_v33 = vld [vmem:[#allocation2 + $0x8] sm:$0xff]  ;;  %v1362_v35 = vld [vmem:[#allocation5 + $0xa0] sm:$0xff]  ;;  %v1364_v36 = vld [vmem:[#allocation5 + $0xa8] sm:$0xff]  ;;  %v108_v46 = vsub.f32 %v1344_v26, %v1313_v0  ;;  %v1400_v54 = vand.u32 2147483647, %v96_v18  ;;  %v2144_v20 = vsub.f32 %v1348_v28, %v1313_v0  ;;  %v242_v28 = vcombine.high %v1342_v25, %v1342_v25 }
  0x2e   :  { %v1360_v34 = vld [vmem:[#allocation5 + $0x98] sm:$0xff]  ;;  %v1374_v41 = vld [vmem:[#allocation5 + $0xb0] sm:$0xff]  ;;  %v1378_v43 = vld [vmem:[#allocation5 + $0xc0] sm:$0xff]  ;;  %v1414_v61 = vand.u32 2147483647, %v97_v22  ;;  %v2146_v26 = vsub.f32 %v1362_v35, %v1313_v0  ;;  %v243_v35 = vcombine.high %v1356_v32, %v1356_v32  ;;  %p1248_p6 = pnand %p1247_p5, %p1241_p2 }
  0x2f   :  { %v1376_v42 = vld [vmem:[#allocation5 + $0xb8] sm:$0xff]  ;;  %v1388_v48 = vld [vmem:[#allocation5 + $0xc8] sm:$0xff]  ;;  %v1390_v49 = vld [vmem:[#allocation5 + $0xd0] sm:$0xff]  ;;  %v116_v3 = vsub.f32 %v1378_v43, %v1313_v0  ;;  %v1428_v5 = vand.u32 2147483647, %v98_v23  ;;  %v2145_v21 = vsub.f32 %v1360_v34, %v1313_v0 }
  0x30   :  { %v1392_v50 = vld [vmem:[#allocation5 + $0xd8] sm:$0xff]  ;;  %v1402_v55 = vld [vmem:[#allocation5 + $0xe0] sm:$0xff]  ;;  %v1404_v56 = vld [vmem:[#allocation5 + $0xe8] sm:$0xff]  ;;  %v115_v2 = vsub.f32 %v1376_v42, %v1313_v0  ;;  %v117_v4 = vsub.f32 %v1388_v48, %v1358_v33  ;;  %v118_v9 = vsub.f32 %v1390_v49, %v1358_v33  ;;  %v1442_v12 = vand.u32 2147483647, %v99_v24 }
  0x31   :  { %v1406_v57 = vld [vmem:[#allocation5 + $0xf0] sm:$0xff]  ;;  %v1416_v62 = vld [vmem:[#allocation5 + $0xf8] sm:$0xff]  ;;  %v1418_v63 = vld [vmem:[#allocation5 + $0x100] sm:$0xff]  ;;  %v119_v10 = vsub.f32 %v1392_v50, %v1358_v33  ;;  %v120_v11 = vsub.f32 %v1402_v55, %v1358_v33  ;;  %v121_v22 = vsub.f32 %v1404_v56, %v1358_v33  ;;  %v1456_v43 = vand.u32 2147483647, %v100_v29 }
  0x32   :  { %v1420_v1 = vld [vmem:[#allocation5 + $0x108] sm:$0xff]  ;;  %v1430_v6 = vld [vmem:[#allocation5 + $0x110] sm:$0xff]  ;;  %v1432_v7 = vld [vmem:[#allocation5 + $0x118] sm:$0xff]  ;;  %v122_v23 = vsub.f32 %v1406_v57, %v1358_v33  ;;  %v123_v42 = vsub.f32 %v1416_v62, %v1358_v33  ;;  %v124_v50 = vsub.f32 %v1418_v63, %v1358_v33  ;;  %v1470_v57 = vand.u32 2147483647, %v101_v30 }
  0x33   :  { %v1434_v8 = vld [vmem:[#allocation5 + $0x120] sm:$0xff]  ;;  %v1444_v13 = vld [vmem:[#allocation5 + $0x128] sm:$0xff]  ;;  %v1446_v17 = vld [vmem:[#allocation5 + $0x130] sm:$0xff]  ;;  %v125_v55 = vsub.f32 %v1420_v1, %v1358_v33  ;;  %v126_v56 = vsub.f32 %v1430_v6, %v1358_v33  ;;  %v127_v59 = vsub.f32 %v1432_v7, %v1358_v33  ;;  %v1487_v30 = vand.u32 2147483647, %v102_v31 }
  0x34   :  { %v1448_v18 = vld [vmem:[#allocation5 + $0x138] sm:$0xff]  ;;  %v1458_v48 = vld [vmem:[#allocation5 + $0x140] sm:$0xff]  ;;  %v1460_v24 = vld [vmem:[#allocation5 + $0x148] sm:$0xff]  ;;  %v128_v63 = vsub.f32 %v1434_v8, %v1358_v33  ;;  %v129_v1 = vsub.f32 %v1444_v13, %v1358_v33  ;;  %v130_v52 = vsub.f32 %v1446_v17, %v1358_v33  ;;  %v1498_v13 = vand.u32 2147483647, %v103_v37 }
  0x35   :  { %v1462_v49 = vld [vmem:[#allocation5 + $0x150] sm:$0xff]  ;;  %v1472_v62 = vld [vmem:[#allocation5 + $0x158] sm:$0xff]  ;;  %v1474_v29 = vld [vmem:[#allocation5 + $0x160] sm:$0xff]  ;;  %v131_v7 = vsub.f32 %v1448_v18, %v1358_v33  ;;  %v132_v8 = vsub.f32 %v1458_v48, %v1358_v33  ;;  %v133_v31 = vsub.f32 %v1460_v24, %v1358_v33  ;;  %v1509_v18 = vand.u32 2147483647, %v104_v38 }
  0x36   :  { %v1476_v60 = vld [vmem:[#allocation5 + $0x168] sm:$0xff]  ;;  %v88_v6 = vld [vmem:[#allocation5 + $0x170] sm:$0xff]  ;;  %v89_v58 = vld [vmem:[#allocation5 + $0x178] sm:$0xff]  ;;  %v134_v51 = vsub.f32 %v1462_v49, %v1358_v33  ;;  %v135_v17 = vsub.f32 %v1472_v62, %v1358_v33  ;;  %v136_v15 = vsub.f32 %v1474_v29, %v1358_v33  ;;  %v1519_v24 = vand.u32 2147483647, %v105_v39 }
  0x37   :  { %v90_v53 = vld [vmem:[#allocation5 + $0x180] sm:$0xff]  ;;  %v91_v14 = vld [vmem:[#allocation5 + $0x188] sm:$0xff]  ;;  %v137_v37 = vsub.f32 %v1476_v60, %v1358_v33  ;;  %v138_v48 = vsub.f32 %v88_v6, %v1358_v33  ;;  %v139_v49 = vsub.f32 %v89_v58, %v1358_v33  ;;  %v1526_v16 = vand.u32 2147483647, %v106_v44 }
  0x38   :  { %v140_v62 = vsub.f32 %v90_v53, %v1358_v33  ;;  %v1531_v38 = vand.u32 2147483647, %v107_v45  ;;  %v141_v60 = vsub.f32 %v91_v14, %v1358_v33  ;;  %v1537_v19 = vand.u32 2147483647, %v108_v46 }
  0x39   :  { %v2143_v39 = vsub.f32 %v1346_v27, %v1313_v0  ;;  %v1547_v44 = vand.u32 2147483647, %v2144_v20  ;;  %v1552_v45 = vand.u32 2147483647, %v2145_v21  ;;  %v1557_v33 = vand.u32 2147483647, %v2146_v26 }
  0x3a   :  { %v2147_v27 = vsub.f32 %v1364_v36, %v1313_v0  ;;  %v2148_v58 = vsub.f32 %v1374_v41, %v1313_v0  ;;  %v1571_v34 = vand.u32 2147483647, %v115_v2  ;;  %v1573_v6 = vand.u32 2147483647, %v116_v3 }
  0x3b   :  { %v1542_v53 = vand.u32 2147483647, %v2143_v39  ;;  %v1577_v14 = vand.u32 2147483647, %v117_v4  ;;  %v1579_v36 = vand.u32 2147483647, %v118_v9  ;;  %v244_v20 = vcombine.high %v1372_v40, %v1372_v40 }
  0x3c   :  { %v1562_v46 = vand.u32 2147483647, %v2147_v27  ;;  %v1569_v29 = vand.u32 2147483647, %v2148_v58  ;;  %v1581_v39 = vand.u32 2147483647, %v119_v10 }
  0x3d   :  { %v1585_v21 = vand.u32 2147483647, %v120_v11  ;;  %v1587_v0 = vand.u32 2147483647, %v121_v22  ;;  %v1589_v41 = vand.u32 2147483647, %v122_v23 }
  0x3e   :  { %v1593_v3 = vand.u32 2147483647, %v123_v42  ;;  %v1595_v4 = vand.u32 2147483647, %v124_v50  ;;  %v1597_v9 = vand.u32 2147483647, %v125_v55 }
  0x3f   :  { %2149 = vst [vmem:[#allocation11_spill] sm:$0xff] %v1589_v41  ;;  %v1601_v26 = vand.u32 2147483647, %v126_v56  ;;  %v1603_v11 = vand.u32 2147483647, %v127_v59 }
  0x40   :  { %2150 = vst [vmem:[#allocation12_spill] sm:$0xff] %v1593_v3  ;;  %2151 = vst [vmem:[#allocation13_spill] sm:$0xff] %v1595_v4  ;;  %v1605_v22 = vand.u32 2147483647, %v128_v63  ;;  %v1609_v27 = vand.u32 2147483647, %v129_v1 }
  0x41   :  { %2152 = vst [vmem:[#allocation14_spill] sm:$0xff] %v1597_v9  ;;  %2153 = vst [vmem:[#allocation15_spill] sm:$0xff] %v1601_v26  ;;  %v1611_v42 = vand.u32 2147483647, %v130_v52  ;;  %v1613_v50 = vand.u32 2147483647, %v131_v7 }
  0x42   :  { %2154 = vst [vmem:[#allocation16_spill] sm:$0xff] %v1603_v11  ;;  %2155 = vst [vmem:[#allocation17_spill] sm:$0xff] %v1605_v22  ;;  %v1617_v58 = vand.u32 2147483647, %v132_v8  ;;  %v1619_v56 = vand.u32 2147483647, %v133_v31 }
  0x43   :  { %2156 = vst [vmem:[#allocation18_spill] sm:$0xff] %v1609_v27  ;;  %2157 = vst [vmem:[#allocation19_spill] sm:$0xff] %v1611_v42  ;;  %v1621_v59 = vand.u32 2147483647, %v134_v51  ;;  %v1625_v10 = vand.u32 2147483647, %v135_v17 }
  0x44   :  { %2158 = vst [vmem:[#allocation20_spill] sm:$0xff] %v1613_v50  ;;  %2159 = vst [vmem:[#allocation21_spill] sm:$0xff] %v1617_v58  ;;  %v1627_v1 = vand.u32 2147483647, %v136_v15  ;;  %v1629_v52 = vand.u32 2147483647, %v137_v37 }
  0x45   :  { %2160 = vst [vmem:[#allocation22_spill] sm:$0xff] %v1619_v56  ;;  %2161 = vst [vmem:[#allocation23_spill] sm:$0xff] %v1621_v59  ;;  %v1633_v23 = vand.u32 2147483647, %v138_v48  ;;  %v1635_v8 = vand.u32 2147483647, %v139_v49 }
  0x46   :  { %2162 = vst [vmem:[#allocation24_spill] sm:$0xff] %v1625_v10  ;;  %2163 = vst [vmem:[#allocation25_spill] sm:$0xff] %v1627_v1  ;;  %v1637_v31 = vand.u32 2147483647, %v140_v62  ;;  %v1641_v63 = vand.u32 2147483647, %v141_v60 }
  0x47   :  { %2164 = vst [vmem:[#allocation26_spill] sm:$0xff] %v1629_v52  ;;  %2165 = vst [vmem:[#allocation27_spill] sm:$0xff] %v1633_v23  ;;  %v343_v62 = vsel %vm342_vm0, %v1342_v25, 0.0  ;;  %v350_v17 = vsel %vm342_vm0, %v242_v28, 0.0  ;;  %v357_v15 = vsel %vm342_vm0, %v1356_v32, 0.0  ;;  %v364_v48 = vsel %vm342_vm0, %v243_v35, 0.0 }
  0x48   :  { %2166 = vst [vmem:[#allocation28_spill] sm:$0xff] %v1635_v8  ;;  %2167 = vst [vmem:[#allocation29_spill] sm:$0xff] %v1637_v31  ;;  %v344_v60 = vrot.slane %v343_v62, 4  ;;  %v351_v51 = vrot.slane %v350_v17, 4  ;;  %v358_v37 = vrot.slane %v357_v15, 4  ;;  %v365_v49 = vrot.slane %v364_v48, 4 }
  0x49   :  { %2168 = vst [vmem:[#allocation30_spill] sm:$0xff] %v1641_v63  ;;  %v371_v7 = vsel %vm342_vm0, %v1372_v40, 0.0  ;;  %v378_v25 = vsel %vm342_vm0, %v244_v20, 0.0  ;;  %v385_v32 = vsel %vm342_vm0, %v1386_v47, 0.0  ;;  %v2169_v35 = vcombine.high %v1386_v47, %v1386_v47 }
  0x4a   :  { %v345_v28 = vadd.f32 %v344_v60, %v343_v62  ;;  %v352_v55 = vadd.f32 %v351_v51, %v350_v17  ;;  %v372_v2 = vrot.slane %v371_v7, 4  ;;  %v379_v59 = vrot.slane %v378_v25, 4 }
  0x4b   :  { %v359_v56 = vadd.f32 %v358_v37, %v357_v15  ;;  %v366_v58 = vadd.f32 %v365_v49, %v364_v48  ;;  %v392_v50 = vsel %vm342_vm0, %v2169_v35, 0.0  ;;  %v386_v15 = vrot.slane %v385_v32, 4 }
  0x4c   :  { %v346_v40 = vrot.slane %v345_v28, 2  ;;  %v373_v27 = vadd.f32 %v372_v2, %v371_v7  ;;  %v380_v20 = vadd.f32 %v379_v59, %v378_v25  ;;  %v393_v37 = vrot.slane %v392_v50, 4 }
  0x4d   :  { %v353_v48 = vrot.slane %v352_v55, 2  ;;  %v360_v49 = vrot.slane %v359_v56, 2  ;;  %v367_v35 = vrot.slane %v366_v58, 2  ;;  %v387_v22 = vadd.f32 %v386_v15, %v385_v32 }
  0x4e   :  { %v374_v62 = vrot.slane %v373_v27, 2  ;;  %v381_v47 = vrot.slane %v380_v20, 2  ;;  %v1739_v60 = vadd.f32 %v346_v40, %v345_v28  ;;  %v394_v42 = vadd.f32 %v393_v37, %v392_v50 }
  0x4f   :  { %v388_v52 = vrot.slane %v387_v22, 2  ;;  %v1749_v40 = vadd.f32 %v353_v48, %v352_v55  ;;  %v1751_v32 = vadd.f32 %v360_v49, %v359_v56  ;;  %v1754_v2 = vadd.f32 %v367_v35, %v366_v58 }
  0x50   :  { %v375_v7 = vadd.f32 %v374_v62, %v373_v27  ;;  %v382_v25 = vadd.f32 %v381_v47, %v380_v20  ;;  %v395_v28 = vrot.slane %v394_v42, 2  ;;  %v399_v17 = vsel %vm342_vm0, %v1400_v54, 0.0 }
  0x51   :  { %v389_v27 = vadd.f32 %v388_v52, %v387_v22  ;;  %v2170_v51 = vcombine.high %v1400_v54, %v1400_v54  ;;  %v400_v49 = vrot.slane %v399_v17, 4  ;;  %v413_v58 = vsel %vm342_vm0, %v1414_v61, 0.0 }
  0x52   :  { %v376_v50 = vrot.slane %v375_v7, 1  ;;  %v383_v15 = vrot.slane %v382_v25, 1  ;;  %v396_v20 = vadd.f32 %v395_v28, %v394_v42  ;;  %v2171_v22 = vcombine.high %v1414_v61, %v1414_v61 }
  0x53   :  { %v406_v55 = vsel %vm342_vm0, %v2170_v51, 0.0  ;;  %v390_v56 = vrot.slane %v389_v27, 1  ;;  %v427_v52 = vsel %vm342_vm0, %v1428_v5, 0.0  ;;  %v2172_v54 = vcombine.high %v1428_v5, %v1428_v5 }
  0x54   :  { %v377_v62 = vadd.f32 %v376_v50, %v375_v7  ;;  %v384_v47 = vadd.f32 %v383_v15, %v382_v25  ;;  %v397_v48 = vrot.slane %v396_v20, 1  ;;  %v407_v59 = vrot.slane %v406_v55, 4 }
  0x55   :  { %v420_v42 = vsel %vm342_vm0, %v2171_v22, 0.0  ;;  %v434_v51 = vsel %vm342_vm0, %v2172_v54, 0.0  ;;  %v391_v35 = vadd.f32 %v390_v56, %v389_v27  ;;  %v401_v25 = vadd.f32 %v400_v49, %v399_v17 }
  0x56   :  { %v398_v7 = vadd.f32 %v397_v48, %v396_v20  ;;  %v408_v28 = vadd.f32 %v407_v59, %v406_v55  ;;  %v414_v50 = vrot.slane %v413_v58, 4  ;;  %v421_v15 = vrot.slane %v420_v42, 4 }
  0x57   :  { %v428_v37 = vrot.slane %v427_v52, 4  ;;  %v435_v63 = vrot.slane %v434_v51, 4  ;;  %v1044_v31 = vmin.f32 %v391_v35, %v377_v62  ;;  %v402_v8 = vrot.slane %v401_v25, 2 }
  0x58   :  { %v1068_v61 = vmin.f32 %v398_v7, %v384_v47  ;;  %v409_v22 = vrot.slane %v408_v28, 2  ;;  %v415_v23 = vadd.f32 %v414_v50, %v413_v58  ;;  %v422_v1 = vadd.f32 %v421_v15, %v420_v42 }
  0x59   :  { %v429_v10 = vadd.f32 %v428_v37, %v427_v52  ;;  %v436_v11 = vadd.f32 %v435_v63, %v434_v51  ;;  %v403_v26 = vadd.f32 %v402_v8, %v401_v25  ;;  %v441_v27 = vsel %vm342_vm0, %v1442_v12, 0.0 }
  0x5a   :  { %v410_v5 = vadd.f32 %v409_v22, %v408_v28  ;;  %v2173_v17 = vcombine.high %v1442_v12, %v1442_v12  ;;  %v416_v20 = vrot.slane %v415_v23, 2  ;;  %v423_v55 = vrot.slane %v422_v1, 2 }
  0x5b   :  { %v430_v62 = vrot.slane %v429_v10, 2  ;;  %v437_v47 = vrot.slane %v436_v11, 2  ;;  %v404_v56 = vrot.slane %v403_v26, 1  ;;  %v442_v49 = vrot.slane %v441_v27, 4 }
  0x5c   :  { %v448_v59 = vsel %vm342_vm0, %v2173_v17, 0.0  ;;  %v411_v48 = vrot.slane %v410_v5, 1  ;;  %v417_v37 = vadd.f32 %v416_v20, %v415_v23  ;;  %v424_v63 = vadd.f32 %v423_v55, %v422_v1 }
  0x5d   :  { %v449_v58 = vrot.slane %v448_v59, 4  ;;  %v431_v8 = vadd.f32 %v430_v62, %v429_v10  ;;  %v438_v42 = vadd.f32 %v437_v47, %v436_v11  ;;  %v405_v52 = vadd.f32 %v404_v56, %v403_v26 }
  0x5e   :  { %v412_v54 = vadd.f32 %v411_v48, %v410_v5  ;;  %v443_v51 = vadd.f32 %v442_v49, %v441_v27  ;;  %v418_v7 = vrot.slane %v417_v37, 1  ;;  %v425_v12 = vrot.slane %v424_v63, 1 }
  0x5f   :  { %v450_v35 = vadd.f32 %v449_v58, %v448_v59  ;;  %v432_v25 = vrot.slane %v431_v8, 1  ;;  %v439_v28 = vrot.slane %v438_v42, 1  ;;  %v1045_v50 = vmin.f32 %v1044_v31, %v405_v52 }
  0x60   :  { %v1069_v15 = vmin.f32 %v1068_v61, %v412_v54  ;;  %v444_v22 = vrot.slane %v443_v51, 2  ;;  %v419_v9 = vadd.f32 %v418_v7, %v417_v37  ;;  %v426_v4 = vadd.f32 %v425_v12, %v424_v63 }
  0x61   :  { %v451_v17 = vrot.slane %v450_v35, 2  ;;  %v433_v3 = vadd.f32 %v432_v25, %v431_v8  ;;  %v440_v41 = vadd.f32 %v439_v28, %v438_v42  ;;  %v455_v10 = vsel %vm342_vm0, %v1456_v43, 0.0 }
  0x62   :  { %v445_v23 = vadd.f32 %v444_v22, %v443_v51  ;;  %v2174_v26 = vcombine.high %v1456_v43, %v1456_v43  ;;  %v1046_v5 = vmin.f32 %v1045_v50, %v419_v9  ;;  %v1070_v27 = vmin.f32 %v1069_v15, %v426_v4 }
  0x63   :  { %v452_v1 = vadd.f32 %v451_v17, %v450_v35  ;;  %v456_v31 = vrot.slane %v455_v10, 4  ;;  %v469_v55 = vsel %vm342_vm0, %v1470_v57, 0.0  ;;  %v2175_v62 = vcombine.high %v1470_v57, %v1470_v57 }
  0x64   :  { %v462_v11 = vsel %vm342_vm0, %v2174_v26, 0.0  ;;  %v446_v59 = vrot.slane %v445_v23, 1  ;;  %v1047_v56 = vmin.f32 %v1046_v5, %v433_v3  ;;  %v1071_v48 = vmin.f32 %v1070_v27, %v440_v41 }
  0x65   :  { %v463_v61 = vrot.slane %v462_v11, 4  ;;  %v453_v20 = vrot.slane %v452_v1, 1  ;;  %v476_v47 = vsel %vm342_vm0, %v2175_v62, 0.0  ;;  %v457_v49 = vadd.f32 %v456_v31, %v455_v10 }
  0x66   :  { %v447_v58 = vadd.f32 %v446_v59, %v445_v23  ;;  %v470_v9 = vrot.slane %v469_v55, 4  ;;  %v477_v4 = vrot.slane %v476_v47, 4  ;;  %v483_v42 = vsel %vm342_vm0, %v1487_v30, 0.0 }
  0x67   :  { %v464_v43 = vadd.f32 %v463_v61, %v462_v11  ;;  %v454_v37 = vadd.f32 %v453_v20, %v452_v1  ;;  %v458_v63 = vrot.slane %v457_v49, 2  ;;  %v2176_v52 = vcombine.high %v1487_v30, %v1487_v30 }
  0x68   :  { %v1048_v54 = vmin.f32 %v1047_v56, %v447_v58  ;;  %v471_v3 = vadd.f32 %v470_v9, %v469_v55  ;;  %v478_v41 = vadd.f32 %v477_v4, %v476_v47  ;;  %v484_v12 = vrot.slane %v483_v42, 4 }
  0x69   :  { %v465_v8 = vrot.slane %v464_v43, 2  ;;  %v490_v57 = vsel %vm342_vm0, %v2176_v52, 0.0  ;;  %v1072_v51 = vmin.f32 %v1071_v48, %v454_v37  ;;  %v459_v35 = vadd.f32 %v458_v63, %v457_v49 }
  0x6a   :  { %v491_v25 = vrot.slane %v490_v57, 4  ;;  %v472_v28 = vrot.slane %v471_v3, 2  ;;  %v479_v50 = vrot.slane %v478_v41, 2  ;;  %v497_v15 = vsel %vm342_vm0, %v1498_v13, 0.0 }
  0x6b   :  { %v466_v7 = vadd.f32 %v465_v8, %v464_v43  ;;  %v2177_v22 = vcombine.high %v1498_v13, %v1498_v13  ;;  %v460_v17 = vrot.slane %v459_v35, 1  ;;  %v485_v1 = vadd.f32 %v484_v12, %v483_v42 }
  0x6c   :  { %v492_v10 = vadd.f32 %v491_v25, %v490_v57  ;;  %v473_v26 = vadd.f32 %v472_v28, %v471_v3  ;;  %v480_v11 = vadd.f32 %v479_v50, %v478_v41  ;;  %v498_v5 = vrot.slane %v497_v15, 4 }
  0x6d   :  { %v504_v30 = vsel %vm342_vm0, %v2177_v22, 0.0  ;;  %v467_v23 = vrot.slane %v466_v7, 1  ;;  %v461_v31 = vadd.f32 %v460_v17, %v459_v35  ;;  %v486_v59 = vrot.slane %v485_v1, 2 }
  0x6e   :  { %v505_v27 = vrot.slane %v504_v30, 4  ;;  %v493_v20 = vrot.slane %v492_v10, 2  ;;  %v474_v55 = vrot.slane %v473_v26, 1  ;;  %v481_v62 = vrot.slane %v480_v11, 1 }
  0x6f   :  { %v468_v61 = vadd.f32 %v467_v23, %v466_v7  ;;  %v499_v47 = vadd.f32 %v498_v5, %v497_v15  ;;  %v1049_v48 = vmin.f32 %v1048_v54, %v461_v31  ;;  %v487_v49 = vadd.f32 %v486_v59, %v485_v1 }
  0x70   :  { %v506_v56 = vadd.f32 %v505_v27, %v504_v30  ;;  %v494_v43 = vadd.f32 %v493_v20, %v492_v10  ;;  %v475_v58 = vadd.f32 %v474_v55, %v473_v26  ;;  %v482_v37 = vadd.f32 %v481_v62, %v480_v11 }
  0x71   :  { %v1073_v13 = vmin.f32 %v1072_v51, %v468_v61  ;;  %v500_v9 = vrot.slane %v499_v47, 2  ;;  %v488_v63 = vrot.slane %v487_v49, 1  ;;  %v511_v42 = vsel %vm342_vm0, %v1509_v18, 0.0 }
  0x72   :  { %v507_v4 = vrot.slane %v506_v56, 2  ;;  %v495_v8 = vrot.slane %v494_v43, 1  ;;  %v2178_v52 = vcombine.high %v1509_v18, %v1509_v18  ;;  %v1050_v3 = vmin.f32 %v1049_v48, %v475_v58 }
  0x73   :  { %v1074_v41 = vmin.f32 %v1073_v13, %v482_v37  ;;  %v501_v54 = vadd.f32 %v500_v9, %v499_v47  ;;  %v489_v35 = vadd.f32 %v488_v63, %v487_v49  ;;  %v512_v12 = vrot.slane %v511_v42, 4 }
  0x74   :  { %v518_v57 = vsel %vm342_vm0, %v2178_v52, 0.0  ;;  %v508_v51 = vadd.f32 %v507_v4, %v506_v56  ;;  %v496_v7 = vadd.f32 %v495_v8, %v494_v43  ;;  %v525_v15 = vsel %vm342_vm0, %v1519_v24, 0.0 }
  0x75   :  { %v519_v25 = vrot.slane %v518_v57, 4  ;;  %v502_v28 = vrot.slane %v501_v54, 1  ;;  %v2179_v22 = vcombine.high %v1519_v24, %v1519_v24  ;;  %v1051_v30 = vmin.f32 %v1050_v3, %v489_v35 }
  0x76   :  { %v509_v50 = vrot.slane %v508_v51, 1  ;;  %v1075_v17 = vmin.f32 %v1074_v41, %v496_v7  ;;  %v513_v23 = vadd.f32 %v512_v12, %v511_v42  ;;  %v526_v11 = vrot.slane %v525_v15, 4 }
  0x77   :  { %v532_v18 = vsel %vm342_vm0, %v2179_v22, 0.0  ;;  %v520_v1 = vadd.f32 %v519_v25, %v518_v57  ;;  %v503_v10 = vadd.f32 %v502_v28, %v501_v54  ;;  %v539_v61 = vsel %vm342_vm0, %v1526_v16, 0.0 }
  0x78   :  { %v510_v26 = vadd.f32 %v509_v50, %v508_v51  ;;  %v533_v5 = vrot.slane %v532_v18, 4  ;;  %v514_v27 = vrot.slane %v513_v23, 2  ;;  %v2180_v59 = vcombine.high %v1526_v16, %v1526_v16 }
  0x79   :  { %v521_v31 = vrot.slane %v520_v1, 2  ;;  %v1052_v20 = vmin.f32 %v1051_v30, %v503_v10  ;;  %v527_v62 = vadd.f32 %v526_v11, %v525_v15  ;;  %v540_v13 = vrot.slane %v539_v61, 4 }
  0x7a   :  { %v546_v24 = vsel %vm342_vm0, %v2180_v59, 0.0  ;;  %v1076_v55 = vmin.f32 %v1075_v17, %v510_v26  ;;  %v534_v47 = vadd.f32 %v533_v5, %v532_v18  ;;  %v515_v56 = vadd.f32 %v514_v27, %v513_v23 }
  0x7b   :  { %v522_v48 = vadd.f32 %v521_v31, %v520_v1  ;;  %v547_v49 = vrot.slane %v546_v24, 4  ;;  %v528_v43 = vrot.slane %v527_v62, 2  ;;  %v553_v37 = vsel %vm342_vm0, %v1531_v38, 0.0 }
  0x7c   :  { %v535_v58 = vrot.slane %v534_v47, 2  ;;  %v2181_v9 = vcombine.high %v1531_v38, %v1531_v38  ;;  %v516_v4 = vrot.slane %v515_v56, 1  ;;  %v541_v8 = vadd.f32 %v540_v13, %v539_v61 }
  0x7d   :  { %v523_v63 = vrot.slane %v522_v48, 1  ;;  %v548_v42 = vadd.f32 %v547_v49, %v546_v24  ;;  %v529_v52 = vadd.f32 %v528_v43, %v527_v62  ;;  %v554_v3 = vrot.slane %v553_v37, 4 }
  0x7e   :  { %v560_v16 = vsel %vm342_vm0, %v2181_v9, 0.0  ;;  %v536_v57 = vadd.f32 %v535_v58, %v534_v47  ;;  %v517_v54 = vadd.f32 %v516_v4, %v515_v56  ;;  %v542_v35 = vrot.slane %v541_v8, 2 }
  0x7f   :  { %v561_v41 = vrot.slane %v560_v16, 4  ;;  %v524_v51 = vadd.f32 %v523_v63, %v522_v48  ;;  %v549_v7 = vrot.slane %v548_v42, 2  ;;  %v530_v12 = vrot.slane %v529_v52, 1 }
  0x80   :  { %v537_v25 = vrot.slane %v536_v57, 1  ;;  %v555_v28 = vadd.f32 %v554_v3, %v553_v37  ;;  %v1053_v15 = vmin.f32 %v1052_v20, %v517_v54  ;;  %v543_v22 = vadd.f32 %v542_v35, %v541_v8 }
  0x81   :  { %v562_v50 = vadd.f32 %v561_v41, %v560_v16  ;;  %v1077_v38 = vmin.f32 %v1076_v55, %v524_v51  ;;  %v550_v18 = vadd.f32 %v549_v7, %v548_v42  ;;  %v531_v30 = vadd.f32 %v530_v12, %v529_v52 }
  0x82   :  { %v538_v17 = vadd.f32 %v537_v25, %v536_v57  ;;  %v556_v23 = vrot.slane %v555_v28, 2  ;;  %v544_v10 = vrot.slane %v543_v22, 1  ;;  %v567_v11 = vsel %vm342_vm0, %v1537_v19, 0.0 }
  0x83   :  { %v563_v1 = vrot.slane %v562_v50, 2  ;;  %v551_v26 = vrot.slane %v550_v18, 1  ;;  %v2182_v5 = vcombine.high %v1537_v19, %v1537_v19  ;;  %v1054_v31 = vmin.f32 %v1053_v15, %v531_v30 }
  0x84   :  { %v1078_v61 = vmin.f32 %v1077_v38, %v538_v17  ;;  %v557_v59 = vadd.f32 %v556_v23, %v555_v28  ;;  %v545_v20 = vadd.f32 %v544_v10, %v543_v22  ;;  %v568_v62 = vrot.slane %v567_v11, 4 }
  0x85   :  { %v574_v27 = vsel %vm342_vm0, %v2182_v5, 0.0  ;;  %v564_v24 = vadd.f32 %v563_v1, %v562_v50  ;;  %v552_v55 = vadd.f32 %v551_v26, %v550_v18  ;;  %v581_v13 = vsel %vm342_vm0, %v1542_v53, 0.0 }
  0x86   :  { %v575_v47 = vrot.slane %v574_v27, 4  ;;  %v558_v56 = vrot.slane %v557_v59, 1  ;;  %v2183_v49 = vcombine.high %v1542_v53, %v1542_v53  ;;  %v1055_v43 = vmin.f32 %v1054_v31, %v545_v20 }
  0x87   :  { %v565_v48 = vrot.slane %v564_v24, 1  ;;  %v1079_v58 = vmin.f32 %v1078_v61, %v552_v55  ;;  %v569_v37 = vadd.f32 %v568_v62, %v567_v11  ;;  %v582_v63 = vrot.slane %v581_v13, 4 }
  0x88   :  { %v588_v19 = vsel %vm342_vm0, %v2183_v49, 0.0  ;;  %v576_v9 = vadd.f32 %v575_v47, %v574_v27  ;;  %v559_v16 = vadd.f32 %v558_v56, %v557_v59  ;;  %v595_v57 = vsel %vm342_vm0, %v1547_v44, 0.0 }
  0x89   :  { %v566_v4 = vadd.f32 %v565_v48, %v564_v24  ;;  %v589_v8 = vrot.slane %v588_v19, 4  ;;  %v570_v42 = vrot.slane %v569_v37, 2  ;;  %v2184_v3 = vcombine.high %v1547_v44, %v1547_v44 }
  0x8a   :  { %v577_v52 = vrot.slane %v576_v9, 2  ;;  %v1056_v41 = vmin.f32 %v1055_v43, %v559_v16  ;;  %v583_v51 = vadd.f32 %v582_v63, %v581_v13  ;;  %v596_v25 = vrot.slane %v595_v57, 4 }
  0x8b   :  { %v602_v53 = vsel %vm342_vm0, %v2184_v3, 0.0  ;;  %v1080_v54 = vmin.f32 %v1079_v58, %v566_v4  ;;  %v590_v35 = vadd.f32 %v589_v8, %v588_v19  ;;  %v571_v7 = vadd.f32 %v570_v42, %v569_v37 }
  0x8c   :  { %v578_v12 = vadd.f32 %v577_v52, %v576_v9  ;;  %v603_v28 = vrot.slane %v602_v53, 4  ;;  %v584_v50 = vrot.slane %v583_v51, 2  ;;  %v609_v38 = vsel %vm342_vm0, %v1552_v45, 0.0 }
  0x8d   :  { %v591_v15 = vrot.slane %v590_v35, 2  ;;  %v2185_v22 = vcombine.high %v1552_v45, %v1552_v45  ;;  %v572_v18 = vrot.slane %v571_v7, 1  ;;  %v597_v17 = vadd.f32 %v596_v25, %v595_v57 }
  0x8e   :  { %v579_v30 = vrot.slane %v578_v12, 1  ;;  %v604_v23 = vadd.f32 %v603_v28, %v602_v53  ;;  %v585_v1 = vadd.f32 %v584_v50, %v583_v51  ;;  %v610_v26 = vrot.slane %v609_v38, 4 }
  0x8f   :  { %v616_v44 = vsel %vm342_vm0, %v2185_v22, 0.0  ;;  %v592_v10 = vadd.f32 %v591_v15, %v590_v35  ;;  %v573_v5 = vadd.f32 %v572_v18, %v571_v7  ;;  %v598_v31 = vrot.slane %v597_v17, 2 }
  0x90   :  { %v617_v11 = vrot.slane %v616_v44, 4  ;;  %v580_v27 = vadd.f32 %v579_v30, %v578_v12  ;;  %v605_v61 = vrot.slane %v604_v23, 2  ;;  %v586_v59 = vrot.slane %v585_v1, 1 }
  0x91   :  { %v593_v24 = vrot.slane %v592_v10, 1  ;;  %v611_v20 = vadd.f32 %v610_v26, %v609_v38  ;;  %v1057_v62 = vmin.f32 %v1056_v41, %v573_v5  ;;  %v599_v47 = vadd.f32 %v598_v31, %v597_v17 }
  0x92   :  { %v618_v55 = vadd.f32 %v617_v11, %v616_v44  ;;  %v1081_v45 = vmin.f32 %v1080_v54, %v580_v27  ;;  %v606_v56 = vadd.f32 %v605_v61, %v604_v23  ;;  %v587_v48 = vadd.f32 %v586_v59, %v585_v1 }
  0x93   :  { %v594_v13 = vadd.f32 %v593_v24, %v592_v10  ;;  %v612_v49 = vrot.slane %v611_v20, 2  ;;  %v600_v43 = vrot.slane %v599_v47, 1  ;;  %v623_v37 = vsel %vm342_vm0, %v1557_v33, 0.0 }
  0x94   :  { %v619_v19 = vrot.slane %v618_v55, 2  ;;  %v607_v58 = vrot.slane %v606_v56, 1  ;;  %v2186_v9 = vcombine.high %v1557_v33, %v1557_v33  ;;  %v1058_v4 = vmin.f32 %v1057_v62, %v587_v48 }
  0x95   :  { %v1082_v63 = vmin.f32 %v1081_v45, %v594_v13  ;;  %v613_v8 = vadd.f32 %v612_v49, %v611_v20  ;;  %v601_v52 = vadd.f32 %v600_v43, %v599_v47  ;;  %v624_v3 = vrot.slane %v623_v37, 4 }
  0x96   :  { %v630_v16 = vsel %vm342_vm0, %v2186_v9, 0.0  ;;  %v620_v42 = vadd.f32 %v619_v19, %v618_v55  ;;  %v608_v57 = vadd.f32 %v607_v58, %v606_v56  ;;  %v637_v51 = vsel %vm342_vm0, %v1562_v46, 0.0 }
  0x97   :  { %v631_v53 = vrot.slane %v630_v16, 4  ;;  %v614_v41 = vrot.slane %v613_v8, 1  ;;  %v2187_v35 = vcombine.high %v1562_v46, %v1562_v46  ;;  %v1059_v7 = vmin.f32 %v1058_v4, %v601_v52 }
  0x98   :  { %v621_v54 = vrot.slane %v620_v42, 1  ;;  %v1083_v12 = vmin.f32 %v1082_v63, %v608_v57  ;;  %v625_v25 = vadd.f32 %v624_v3, %v623_v37  ;;  %v638_v38 = vrot.slane %v637_v51, 4 }
  0x99   :  { %v644_v33 = vsel %vm342_vm0, %v2187_v35, 0.0  ;;  %v632_v28 = vadd.f32 %v631_v53, %v630_v16  ;;  %v615_v50 = vadd.f32 %v614_v41, %v613_v8  ;;  %v651_v30 = vsel %vm342_vm0, %v1569_v29, 0.0 }
  0x9a   :  { %v622_v15 = vadd.f32 %v621_v54, %v620_v42  ;;  %v645_v22 = vrot.slane %v644_v33, 4  ;;  %v626_v44 = vrot.slane %v625_v25, 2  ;;  %v2188_v17 = vcombine.high %v1569_v29, %v1569_v29 }
  0x9b   :  { %v633_v18 = vrot.slane %v632_v28, 2  ;;  %v1060_v23 = vmin.f32 %v1059_v7, %v615_v50  ;;  %v639_v10 = vadd.f32 %v638_v38, %v637_v51  ;;  %v652_v27 = vrot.slane %v651_v30, 4 }
  0x9c   :  { %v658_v46 = vsel %vm342_vm0, %v2188_v17, 0.0  ;;  %v1084_v1 = vmin.f32 %v1083_v12, %v622_v15  ;;  %v646_v26 = vadd.f32 %v645_v22, %v644_v33  ;;  %v627_v11 = vadd.f32 %v626_v44, %v625_v25 }
  0x9d   :  { %v634_v5 = vadd.f32 %v633_v18, %v632_v28  ;;  %v659_v31 = vrot.slane %v658_v46, 4  ;;  %v640_v61 = vrot.slane %v639_v10, 2  ;;  %v665_v24 = vsel %vm342_vm0, %v1571_v34, 0.0 }
  0x9e   :  { %v647_v59 = vrot.slane %v646_v26, 2  ;;  %v2189_v20 = vcombine.high %v1571_v34, %v1571_v34  ;;  %v628_v55 = vrot.slane %v627_v11, 1  ;;  %v653_v45 = vadd.f32 %v652_v27, %v651_v30 }
  0x9f   :  { %v635_v62 = vrot.slane %v634_v5, 1  ;;  %v660_v47 = vadd.f32 %v659_v31, %v658_v46  ;;  %v641_v56 = vadd.f32 %v640_v61, %v639_v10  ;;  %v666_v13 = vrot.slane %v665_v24, 4 }
  0xa0   :  { %v672_v29 = vsel %vm342_vm0, %v2189_v20, 0.0  ;;  %v648_v48 = vadd.f32 %v647_v59, %v646_v26  ;;  %v629_v19 = vadd.f32 %v628_v55, %v627_v11  ;;  %v654_v58 = vrot.slane %v653_v45, 2 }
  0xa1   :  { %v673_v49 = vrot.slane %v672_v29, 4  ;;  %v636_v43 = vadd.f32 %v635_v62, %v634_v5  ;;  %v661_v37 = vrot.slane %v660_v47, 2  ;;  %v642_v9 = vrot.slane %v641_v56, 1 }
  0xa2   :  { %v649_v16 = vrot.slane %v648_v48, 1  ;;  %v667_v4 = vadd.f32 %v666_v13, %v665_v24  ;;  %v1061_v8 = vmin.f32 %v1060_v23, %v629_v19  ;;  %v655_v42 = vadd.f32 %v654_v58, %v653_v45 }
  0xa3   :  { %v674_v63 = vadd.f32 %v673_v49, %v672_v29  ;;  %v1085_v34 = vmin.f32 %v1084_v1, %v636_v43  ;;  %v662_v52 = vadd.f32 %v661_v37, %v660_v47  ;;  %v643_v57 = vadd.f32 %v642_v9, %v641_v56 }
  0xa4   :  { %v650_v3 = vadd.f32 %v649_v16, %v648_v48  ;;  %v668_v53 = vrot.slane %v667_v4, 2  ;;  %v656_v54 = vrot.slane %v655_v42, 1  ;;  %v679_v35 = vsel %vm342_vm0, %v1573_v6, 0.0 }
  0xa5   :  { %v675_v41 = vrot.slane %v674_v63, 2  ;;  %v663_v51 = vrot.slane %v662_v52, 1  ;;  %v2190_v33 = vcombine.high %v1573_v6, %v1573_v6  ;;  %v355_v12 = vrot.slane %v1749_v40, 1 }
  0xa6   :  { %v1062_v25 = vmin.f32 %v1061_v8, %v643_v57  ;;  %v669_v28 = vadd.f32 %v668_v53, %v667_v4  ;;  %v1086_v15 = vmin.f32 %v1085_v34, %v650_v3  ;;  %v657_v38 = vadd.f32 %v656_v54, %v655_v42 }
  0xa7   :  { %v686_v7 = vsel %vm342_vm0, %v2190_v33, 0.0  ;;  %v676_v50 = vadd.f32 %v675_v41, %v674_v63  ;;  %v680_v22 = vrot.slane %v679_v35, 4  ;;  %v664_v18 = vadd.f32 %v663_v51, %v662_v52 }
  0xa8   :  { %v687_v44 = vrot.slane %v686_v7, 4  ;;  %v670_v30 = vrot.slane %v669_v28, 1  ;;  %v693_v17 = vsel %vm342_vm0, %v1577_v14, 0.0  ;;  %v2191_v46 = vcombine.high %v1577_v14, %v1577_v14 }
  0xa9   :  { %v362_v23 = vrot.slane %v1751_v32, 1  ;;  %v369_v1 = vrot.slane %v1754_v2, 1  ;;  %v681_v10 = vadd.f32 %v680_v22, %v679_v35  ;;  %v1063_v11 = vmin.f32 %v1062_v25, %v657_v38 }
  0xaa   :  { %v700_v6 = vsel %vm342_vm0, %v2191_v46, 0.0  ;;  %v688_v26 = vadd.f32 %v687_v44, %v686_v7  ;;  %v677_v5 = vrot.slane %v676_v50, 1  ;;  %v694_v27 = vrot.slane %v693_v17, 4 }
  0xab   :  { %v701_v31 = vrot.slane %v700_v6, 4  ;;  %v682_v61 = vrot.slane %v681_v10, 2  ;;  %v707_v24 = vsel %vm342_vm0, %v1579_v36, 0.0  ;;  %v2192_v14 = vcombine.high %v1579_v36, %v1579_v36 }
  0xac   :  { %v689_v59 = vrot.slane %v688_v26, 2  ;;  %v1897_v29 = vmin.f32 %v1086_v15, %v664_v18  ;;  %v671_v55 = vadd.f32 %v670_v30, %v669_v28  ;;  %v695_v62 = vadd.f32 %v694_v27, %v693_v17 }
  0xad   :  { %v714_v20 = vsel %vm342_vm0, %v2192_v14, 0.0  ;;  %v702_v45 = vadd.f32 %v701_v31, %v700_v6  ;;  %v683_v47 = vadd.f32 %v682_v61, %v681_v10  ;;  %v708_v48 = vrot.slane %v707_v24, 4  ;;  %v2197_v61 = vld [vmem:[#allocation11_spill] sm:$0xff] }
  0xae   :  { %v690_v56 = vadd.f32 %v689_v59, %v688_v26  ;;  %v715_v13 = vrot.slane %v714_v20, 4  ;;  %v696_v49 = vrot.slane %v695_v62, 2  ;;  %v721_v43 = vsel %vm342_vm0, %v1581_v39, 0.0 }
  0xaf   :  { %v703_v19 = vrot.slane %v702_v45, 2  ;;  %v2193_v58 = vcombine.high %v1581_v39, %v1581_v39  ;;  %v1905_v37 = vadd.f32 %v677_v5, %v676_v50  ;;  %v684_v9 = vrot.slane %v683_v47, 1 }
  0xb0   :  { %v709_v16 = vadd.f32 %v708_v48, %v707_v24  ;;  %v716_v4 = vadd.f32 %v715_v13, %v714_v20  ;;  %v691_v63 = vrot.slane %v690_v56, 1  ;;  %v1907_v8 = vadd.f32 %v696_v49, %v695_v62 }
  0xb1   :  { %v728_v36 = vsel %vm342_vm0, %v2193_v58, 0.0  ;;  %v722_v34 = vrot.slane %v721_v43, 4  ;;  %v2194_v52 = vrot.slane %v1739_v60, 1  ;;  %v1064_v3 = vmin.f32 %v1063_v11, %v671_v55 }
  0xb2   :  { %v729_v42 = vrot.slane %v728_v36, 4  ;;  %v685_v53 = vadd.f32 %v684_v9, %v683_v47  ;;  %v1914_v39 = vadd.f32 %v703_v19, %v702_v45  ;;  %v1917_v41 = vadd.f32 %v355_v12, %v1749_v40  ;;  %v2199_v19 = vld [vmem:[#allocation12_spill] sm:$0xff] }
  0xb3   :  { %v1912_v57 = vadd.f32 %v2194_v52, %v1739_v60  ;;  %v1920_v54 = vadd.f32 %v362_v23, %v1751_v32  ;;  %v723_v51 = vadd.f32 %v722_v34, %v721_v43  ;;  %v1923_v33 = vadd.f32 %v369_v1, %v1754_v2 }
  0xb4   :  { %v730_v35 = vadd.f32 %v729_v42, %v728_v36  ;;  %v1088_v7 = vmin.f32 %v1897_v29, %v1905_v37  ;;  %v710_v60 = vrot.slane %v709_v16, 2  ;;  %v717_v25 = vrot.slane %v716_v4, 2 }
  0xb5   :  { %v1927_v28 = vadd.f32 %v691_v63, %v690_v56  ;;  %v698_v50 = vrot.slane %v1907_v8, 1  ;;  %v724_v15 = vrot.slane %v723_v51, 2  ;;  %v1930_v12 = vmin.f32 %v1064_v3, %v685_v53 }
  0xb6   :  { %v731_v40 = vrot.slane %v730_v35, 2  ;;  %v705_v32 = vrot.slane %v1914_v39, 1  ;;  %v735_v38 = vsel %vm342_vm0, %v1585_v21, 0.0  ;;  %v2195_v2 = vcombine.high %v1585_v21, %v1585_v21 }
  0xb7   :  { %v725_v44 = vadd.f32 %v724_v15, %v723_v51  ;;  %v736_v30 = vrot.slane %v735_v38, 4  ;;  %v1939_v46 = vadd.f32 %v710_v60, %v709_v16  ;;  %v1941_v6 = vadd.f32 %v717_v25, %v716_v4 }
  0xb8   :  { %v742_v22 = vsel %vm342_vm0, %v2195_v2, 0.0  ;;  %v732_v18 = vadd.f32 %v731_v40, %v730_v35  ;;  %v749_v23 = vsel %vm342_vm0, %v1587_v0, 0.0  ;;  %v2196_v1 = vcombine.high %v1587_v0, %v1587_v0 }
  0xb9   :  { %v743_v17 = vrot.slane %v742_v22, 4  ;;  %v726_v26 = vrot.slane %v725_v44, 1  ;;  %v737_v11 = vadd.f32 %v736_v30, %v735_v38  ;;  %v750_v27 = vrot.slane %v749_v23, 4 }
  0xba   :  { %v756_v10 = vsel %vm342_vm0, %v2196_v1, 0.0  ;;  %v733_v21 = vrot.slane %v732_v18, 1  ;;  %v763_v59 = vsel %vm342_vm0, %v2197_v61, 0.0  ;;  %v2198_v24 = vcombine.high %v2197_v61, %v2197_v61 }
  0xbb   :  { %v744_v5 = vadd.f32 %v743_v17, %v742_v22  ;;  %v757_v31 = vrot.slane %v756_v10, 4  ;;  %v727_v20 = vadd.f32 %v726_v26, %v725_v44  ;;  %v738_v62 = vrot.slane %v737_v11, 2 }
  0xbc   :  { %v770_v14 = vsel %vm342_vm0, %v2198_v24, 0.0  ;;  %v734_v55 = vadd.f32 %v733_v21, %v732_v18  ;;  %v751_v45 = vadd.f32 %v750_v27, %v749_v23  ;;  %v764_v56 = vrot.slane %v763_v59, 4 }
  0xbd   :  { %v745_v0 = vrot.slane %v744_v5, 2  ;;  %v758_v47 = vadd.f32 %v757_v31, %v756_v10  ;;  %v771_v48 = vrot.slane %v770_v14, 4  ;;  %v739_v13 = vadd.f32 %v738_v62, %v737_v11  ;;  %v2201_v31 = vld [vmem:[#allocation13_spill] sm:$0xff] }
  0xbe   :  { %v777_v43 = vsel %vm342_vm0, %v2199_v19, 0.0  ;;  %v2200_v58 = vcombine.high %v2199_v19, %v2199_v19  ;;  %v752_v9 = vrot.slane %v751_v45, 2  ;;  %v765_v4 = vadd.f32 %v764_v56, %v763_v59 }
  0xbf   :  { %v746_v49 = vadd.f32 %v745_v0, %v744_v5  ;;  %v759_v16 = vrot.slane %v758_v47, 2  ;;  %v772_v63 = vadd.f32 %v771_v48, %v770_v14  ;;  %v740_v34 = vrot.slane %v739_v13, 1 }
  0xc0   :  { %v784_v36 = vsel %vm342_vm0, %v2200_v58, 0.0  ;;  %v778_v52 = vrot.slane %v777_v43, 4  ;;  %v753_v53 = vadd.f32 %v752_v9, %v751_v45  ;;  %v766_v35 = vrot.slane %v765_v4, 2 }
  0xc1   :  { %v747_v42 = vrot.slane %v746_v49, 1  ;;  %v785_v3 = vrot.slane %v784_v36, 4  ;;  %v760_v51 = vadd.f32 %v759_v16, %v758_v47  ;;  %v773_v60 = vrot.slane %v772_v63, 2 }
  0xc2   :  { %v741_v25 = vadd.f32 %v740_v34, %v739_v13  ;;  %v779_v40 = vadd.f32 %v778_v52, %v777_v43  ;;  %v754_v2 = vrot.slane %v753_v53, 1  ;;  %v767_v44 = vadd.f32 %v766_v35, %v765_v4 }
  0xc3   :  { %v748_v15 = vadd.f32 %v747_v42, %v746_v49  ;;  %v786_v38 = vadd.f32 %v785_v3, %v784_v36  ;;  %v761_v22 = vrot.slane %v760_v51, 1  ;;  %v774_v18 = vadd.f32 %v773_v60, %v772_v63  ;;  %v2203_v49 = vld [vmem:[#allocation14_spill] sm:$0xff]  ;;  %v2205_v42 = vld [vmem:[#allocation15_spill] sm:$0xff] }
  0xc4   :  { %v1092_v30 = vmin.f32 %v741_v25, %v727_v20  ;;  %v780_v23 = vrot.slane %v779_v40, 2  ;;  %v755_v10 = vadd.f32 %v754_v2, %v753_v53  ;;  %v768_v21 = vrot.slane %v767_v44, 1 }
  0xc5   :  { %v1116_v17 = vmin.f32 %v748_v15, %v734_v55  ;;  %v787_v1 = vrot.slane %v786_v38, 2  ;;  %v762_v26 = vadd.f32 %v761_v22, %v760_v51  ;;  %v775_v11 = vrot.slane %v774_v18, 1 }
  0xc6   :  { %v781_v5 = vadd.f32 %v780_v23, %v779_v40  ;;  %v791_v61 = vsel %vm342_vm0, %v2201_v31, 0.0  ;;  %v2202_v59 = vcombine.high %v2201_v31, %v2201_v31  ;;  %v1093_v14 = vmin.f32 %v1092_v30, %v755_v10 }
  0xc7   :  { %v788_v27 = vadd.f32 %v787_v1, %v786_v38  ;;  %v1117_v62 = vmin.f32 %v1116_v17, %v762_v26  ;;  %v769_v20 = vadd.f32 %v768_v21, %v767_v44  ;;  %v776_v55 = vadd.f32 %v775_v11, %v774_v18  ;;  %v2207_v18 = vld [vmem:[#allocation16_spill] sm:$0xff] }
  0xc8   :  { %v798_v24 = vsel %vm342_vm0, %v2202_v59, 0.0  ;;  %v782_v0 = vrot.slane %v781_v5, 1  ;;  %v792_v47 = vrot.slane %v791_v61, 4  ;;  %v805_v19 = vsel %vm342_vm0, %v2203_v49, 0.0 }
  0xc9   :  { %v789_v45 = vrot.slane %v788_v27, 1  ;;  %v799_v56 = vrot.slane %v798_v24, 4  ;;  %v1094_v48 = vmin.f32 %v1093_v14, %v769_v20  ;;  %v1118_v13 = vmin.f32 %v1117_v62, %v776_v55 }
  0xca   :  { %v2204_v43 = vcombine.high %v2203_v49, %v2203_v49  ;;  %v783_v36 = vadd.f32 %v782_v0, %v781_v5  ;;  %v793_v16 = vadd.f32 %v792_v47, %v791_v61  ;;  %v806_v63 = vrot.slane %v805_v19, 4 }
  0xcb   :  { %v790_v9 = vadd.f32 %v789_v45, %v788_v27  ;;  %v800_v4 = vadd.f32 %v799_v56, %v798_v24  ;;  %v819_v52 = vsel %vm342_vm0, %v2205_v42, 0.0  ;;  %v2206_v3 = vcombine.high %v2205_v42, %v2205_v42 }
  0xcc   :  { %v812_v58 = vsel %vm342_vm0, %v2204_v43, 0.0  ;;  %v1095_v51 = vmin.f32 %v1094_v48, %v783_v36  ;;  %v794_v60 = vrot.slane %v793_v16, 2  ;;  %v807_v15 = vadd.f32 %v806_v63, %v805_v19 }
  0xcd   :  { %v813_v34 = vrot.slane %v812_v58, 4  ;;  %v826_v53 = vsel %vm342_vm0, %v2206_v3, 0.0  ;;  %v1119_v35 = vmin.f32 %v1118_v13, %v790_v9  ;;  %v801_v25 = vrot.slane %v800_v4, 2 }
  0xce   :  { %v820_v38 = vrot.slane %v819_v52, 4  ;;  %v827_v2 = vrot.slane %v826_v53, 4  ;;  %v795_v22 = vadd.f32 %v794_v60, %v793_v16  ;;  %v833_v30 = vsel %vm342_vm0, %v2207_v18, 0.0 }
  0xcf   :  { %v814_v40 = vadd.f32 %v813_v34, %v812_v58  ;;  %v802_v44 = vadd.f32 %v801_v25, %v800_v4  ;;  %v2208_v17 = vcombine.high %v2207_v18, %v2207_v18  ;;  %v808_v1 = vrot.slane %v807_v15, 2  ;;  %v2209_v34 = vld [vmem:[#allocation17_spill] sm:$0xff] }
  0xd0   :  { %v821_v26 = vadd.f32 %v820_v38, %v819_v52  ;;  %v828_v21 = vadd.f32 %v827_v2, %v826_v53  ;;  %v796_v11 = vrot.slane %v795_v22, 1  ;;  %v834_v27 = vrot.slane %v833_v30, 4 }
  0xd1   :  { %v840_v23 = vsel %vm342_vm0, %v2208_v17, 0.0  ;;  %v815_v10 = vrot.slane %v814_v40, 2  ;;  %v803_v5 = vrot.slane %v802_v44, 1  ;;  %v809_v61 = vadd.f32 %v808_v1, %v807_v15 }
  0xd2   :  { %v841_v31 = vrot.slane %v840_v23, 4  ;;  %v822_v24 = vrot.slane %v821_v26, 2  ;;  %v829_v14 = vrot.slane %v828_v21, 2  ;;  %v797_v62 = vadd.f32 %v796_v11, %v795_v22 }
  0xd3   :  { %v816_v59 = vadd.f32 %v815_v10, %v814_v40  ;;  %v804_v20 = vadd.f32 %v803_v5, %v802_v44  ;;  %v835_v55 = vadd.f32 %v834_v27, %v833_v30  ;;  %v810_v45 = vrot.slane %v809_v61, 1  ;;  %v2211_v44 = vld [vmem:[#allocation18_spill] sm:$0xff]  ;;  %v2213_v5 = vld [vmem:[#allocation19_spill] sm:$0xff] }
  0xd4   :  { %v842_v0 = vadd.f32 %v841_v31, %v840_v23  ;;  %v823_v56 = vadd.f32 %v822_v24, %v821_v26  ;;  %v830_v48 = vadd.f32 %v829_v14, %v828_v21  ;;  %v1096_v13 = vmin.f32 %v1095_v51, %v797_v62 }
  0xd5   :  { %v817_v47 = vrot.slane %v816_v59, 1  ;;  %v1120_v49 = vmin.f32 %v1119_v35, %v804_v20  ;;  %v836_v19 = vrot.slane %v835_v55, 2  ;;  %v811_v58 = vadd.f32 %v810_v45, %v809_v61 }
  0xd6   :  { %v843_v43 = vrot.slane %v842_v0, 2  ;;  %v824_v9 = vrot.slane %v823_v56, 1  ;;  %v831_v16 = vrot.slane %v830_v48, 1  ;;  %v847_v42 = vsel %vm342_vm0, %v2209_v34, 0.0 }
  0xd7   :  { %v818_v36 = vadd.f32 %v817_v47, %v816_v59  ;;  %v837_v4 = vadd.f32 %v836_v19, %v835_v55  ;;  %v2210_v52 = vcombine.high %v2209_v34, %v2209_v34  ;;  %v1097_v53 = vmin.f32 %v1096_v13, %v811_v58 }
  0xd8   :  { %v844_v63 = vadd.f32 %v843_v43, %v842_v0  ;;  %v825_v51 = vadd.f32 %v824_v9, %v823_v56  ;;  %v832_v35 = vadd.f32 %v831_v16, %v830_v48  ;;  %v848_v40 = vrot.slane %v847_v42, 4  ;;  %v2215_v48 = vld [vmem:[#allocation20_spill] sm:$0xff] }
  0xd9   :  { %v854_v3 = vsel %vm342_vm0, %v2210_v52, 0.0  ;;  %v1121_v60 = vmin.f32 %v1120_v49, %v818_v36  ;;  %v838_v25 = vrot.slane %v837_v4, 1  ;;  %v861_v18 = vsel %vm342_vm0, %v2211_v44, 0.0 }
  0xda   :  { %v845_v15 = vrot.slane %v844_v63, 1  ;;  %v855_v38 = vrot.slane %v854_v3, 4  ;;  %v1098_v2 = vmin.f32 %v1097_v53, %v825_v51  ;;  %v2212_v30 = vcombine.high %v2211_v44, %v2211_v44 }
  0xdb   :  { %v1122_v22 = vmin.f32 %v1121_v60, %v832_v35  ;;  %v839_v23 = vadd.f32 %v838_v25, %v837_v4  ;;  %v849_v10 = vadd.f32 %v848_v40, %v847_v42  ;;  %v862_v21 = vrot.slane %v861_v18, 4 }
  0xdc   :  { %v868_v17 = vsel %vm342_vm0, %v2212_v30, 0.0  ;;  %v846_v1 = vadd.f32 %v845_v15, %v844_v63  ;;  %v856_v26 = vadd.f32 %v855_v38, %v854_v3  ;;  %v875_v27 = vsel %vm342_vm0, %v2213_v5, 0.0 }
  0xdd   :  { %v869_v11 = vrot.slane %v868_v17, 4  ;;  %v2214_v31 = vcombine.high %v2213_v5, %v2213_v5  ;;  %v1099_v59 = vmin.f32 %v1098_v2, %v839_v23  ;;  %v850_v14 = vrot.slane %v849_v10, 2 }
  0xde   :  { %v1123_v24 = vmin.f32 %v1122_v22, %v846_v1  ;;  %v857_v62 = vrot.slane %v856_v26, 2  ;;  %v863_v20 = vadd.f32 %v862_v21, %v861_v18  ;;  %v876_v0 = vrot.slane %v875_v27, 4 }
  0xdf   :  { %v882_v61 = vsel %vm342_vm0, %v2214_v31, 0.0  ;;  %v870_v55 = vadd.f32 %v869_v11, %v868_v17  ;;  %v851_v47 = vadd.f32 %v850_v14, %v849_v10  ;;  %v889_v13 = vsel %vm342_vm0, %v2215_v48, 0.0  ;;  %v2217_v11 = vld [vmem:[#allocation21_spill] sm:$0xff] }
  0xe0   :  { %v883_v45 = vrot.slane %v882_v61, 4  ;;  %v858_v56 = vadd.f32 %v857_v62, %v856_v26  ;;  %v2216_v49 = vcombine.high %v2215_v48, %v2215_v48  ;;  %v864_v43 = vrot.slane %v863_v20, 2 }
  0xe1   :  { %v871_v58 = vrot.slane %v870_v55, 2  ;;  %v877_v36 = vadd.f32 %v876_v0, %v875_v27  ;;  %v852_v16 = vrot.slane %v851_v47, 1  ;;  %v890_v63 = vrot.slane %v889_v13, 4 }
  0xe2   :  { %v896_v19 = vsel %vm342_vm0, %v2216_v49, 0.0  ;;  %v884_v9 = vadd.f32 %v883_v45, %v882_v61  ;;  %v859_v4 = vrot.slane %v858_v56, 1  ;;  %v865_v42 = vadd.f32 %v864_v43, %v863_v20 }
  0xe3   :  { %v897_v34 = vrot.slane %v896_v19, 4  ;;  %v872_v52 = vadd.f32 %v871_v58, %v870_v55  ;;  %v878_v3 = vrot.slane %v877_v36, 2  ;;  %v853_v60 = vadd.f32 %v852_v16, %v851_v47 }
  0xe4   :  { %v885_v53 = vrot.slane %v884_v9, 2  ;;  %v860_v51 = vadd.f32 %v859_v4, %v858_v56  ;;  %v891_v35 = vadd.f32 %v890_v63, %v889_v13  ;;  %v866_v15 = vrot.slane %v865_v42, 1  ;;  %v2219_v56 = vld [vmem:[#allocation22_spill] sm:$0xff]  ;;  %v2221_v4 = vld [vmem:[#allocation23_spill] sm:$0xff] }
  0xe5   :  { %v898_v25 = vadd.f32 %v897_v34, %v896_v19  ;;  %v873_v40 = vrot.slane %v872_v52, 1  ;;  %v879_v38 = vadd.f32 %v878_v3, %v877_v36  ;;  %v1100_v22 = vmin.f32 %v1099_v59, %v853_v60 }
  0xe6   :  { %v886_v2 = vadd.f32 %v885_v53, %v884_v9  ;;  %v1124_v44 = vmin.f32 %v1123_v24, %v860_v51  ;;  %v892_v18 = vrot.slane %v891_v35, 2  ;;  %v867_v17 = vadd.f32 %v866_v15, %v865_v42 }
  0xe7   :  { %v899_v30 = vrot.slane %v898_v25, 2  ;;  %v874_v23 = vadd.f32 %v873_v40, %v872_v52  ;;  %v880_v1 = vrot.slane %v879_v38, 1  ;;  %v903_v5 = vsel %vm342_vm0, %v2217_v11, 0.0 }
  0xe8   :  { %v887_v10 = vrot.slane %v886_v2, 1  ;;  %v893_v26 = vadd.f32 %v892_v18, %v891_v35  ;;  %v2218_v27 = vcombine.high %v2217_v11, %v2217_v11  ;;  %v1101_v61 = vmin.f32 %v1100_v22, %v867_v17 }
  0xe9   :  { %v900_v21 = vadd.f32 %v899_v30, %v898_v25  ;;  %v1125_v14 = vmin.f32 %v1124_v44, %v874_v23  ;;  %v881_v59 = vadd.f32 %v880_v1, %v879_v38  ;;  %v904_v55 = vrot.slane %v903_v5, 4 }
  0xea   :  { %v910_v31 = vsel %vm342_vm0, %v2218_v27, 0.0  ;;  %v888_v24 = vadd.f32 %v887_v10, %v886_v2  ;;  %v894_v62 = vrot.slane %v893_v26, 1  ;;  %v917_v48 = vsel %vm342_vm0, %v2219_v56, 0.0  ;;  %v2223_v2 = vld [vmem:[#allocation24_spill] sm:$0xff] }
  0xeb   :  { %v901_v20 = vrot.slane %v900_v21, 1  ;;  %v911_v0 = vrot.slane %v910_v31, 4  ;;  %v1102_v45 = vmin.f32 %v1101_v61, %v881_v59  ;;  %v2220_v13 = vcombine.high %v2219_v56, %v2219_v56 }
  0xec   :  { %v1126_v47 = vmin.f32 %v1125_v14, %v888_v24  ;;  %v895_v19 = vadd.f32 %v894_v62, %v893_v26  ;;  %v905_v58 = vadd.f32 %v904_v55, %v903_v5  ;;  %v918_v9 = vrot.slane %v917_v48, 4 }
  0xed   :  { %v924_v49 = vsel %vm342_vm0, %v2220_v13, 0.0  ;;  %v902_v43 = vadd.f32 %v901_v20, %v900_v21  ;;  %v912_v36 = vadd.f32 %v911_v0, %v910_v31  ;;  %v931_v63 = vsel %vm342_vm0, %v2221_v4, 0.0 }
  0xee   :  { %v925_v16 = vrot.slane %v924_v49, 4  ;;  %v2222_v34 = vcombine.high %v2221_v4, %v2221_v4  ;;  %v1103_v52 = vmin.f32 %v1102_v45, %v895_v19  ;;  %v906_v53 = vrot.slane %v905_v58, 2 }
  0xef   :  { %v1127_v3 = vmin.f32 %v1126_v47, %v902_v43  ;;  %v913_v60 = vrot.slane %v912_v36, 2  ;;  %v919_v51 = vadd.f32 %v918_v9, %v917_v48  ;;  %v932_v25 = vrot.slane %v931_v63, 4 }
  0xf0   :  { %v938_v42 = vsel %vm342_vm0, %v2222_v34, 0.0  ;;  %v926_v35 = vadd.f32 %v925_v16, %v924_v49  ;;  %v907_v40 = vadd.f32 %v906_v53, %v905_v58  ;;  %v945_v22 = vsel %vm342_vm0, %v2223_v2, 0.0  ;;  %v2225_v16 = vld [vmem:[#allocation25_spill] sm:$0xff] }
  0xf1   :  { %v939_v15 = vrot.slane %v938_v42, 4  ;;  %v914_v38 = vadd.f32 %v913_v60, %v912_v36  ;;  %v2224_v44 = vcombine.high %v2223_v2, %v2223_v2  ;;  %v920_v30 = vrot.slane %v919_v51, 2 }
  0xf2   :  { %v927_v17 = vrot.slane %v926_v35, 2  ;;  %v933_v23 = vadd.f32 %v932_v25, %v931_v63  ;;  %v908_v10 = vrot.slane %v907_v40, 1  ;;  %v946_v21 = vrot.slane %v945_v22, 4 }
  0xf3   :  { %v952_v18 = vsel %vm342_vm0, %v2224_v44, 0.0  ;;  %v940_v1 = vadd.f32 %v939_v15, %v938_v42  ;;  %v915_v26 = vrot.slane %v914_v38, 1  ;;  %v921_v5 = vadd.f32 %v920_v30, %v919_v51 }
  0xf4   :  { %v953_v11 = vrot.slane %v952_v18, 4  ;;  %v928_v27 = vadd.f32 %v927_v17, %v926_v35  ;;  %v934_v31 = vrot.slane %v933_v23, 2  ;;  %v909_v14 = vadd.f32 %v908_v10, %v907_v40 }
  0xf5   :  { %v941_v61 = vrot.slane %v940_v1, 2  ;;  %v916_v59 = vadd.f32 %v915_v26, %v914_v38  ;;  %v947_v24 = vadd.f32 %v946_v21, %v945_v22  ;;  %v922_v20 = vrot.slane %v921_v5, 1  ;;  %v2227_v38 = vld [vmem:[#allocation26_spill] sm:$0xff]  ;;  %v2229_v26 = vld [vmem:[#allocation27_spill] sm:$0xff] }
  0xf6   :  { %v954_v62 = vadd.f32 %v953_v11, %v952_v18  ;;  %v929_v55 = vrot.slane %v928_v27, 1  ;;  %v935_v0 = vadd.f32 %v934_v31, %v933_v23  ;;  %v1104_v47 = vmin.f32 %v1103_v52, %v909_v14 }
  0xf7   :  { %v942_v45 = vadd.f32 %v941_v61, %v940_v1  ;;  %v1128_v56 = vmin.f32 %v1127_v3, %v916_v59  ;;  %v948_v48 = vrot.slane %v947_v24, 2  ;;  %v923_v49 = vadd.f32 %v922_v20, %v921_v5 }
  0xf8   :  { %v955_v13 = vrot.slane %v954_v62, 2  ;;  %v930_v19 = vadd.f32 %v929_v55, %v928_v27  ;;  %v936_v43 = vrot.slane %v935_v0, 1  ;;  %v959_v4 = vsel %vm342_vm0, %v2225_v16, 0.0 }
  0xf9   :  { %v943_v58 = vrot.slane %v942_v45, 1  ;;  %v949_v36 = vadd.f32 %v948_v48, %v947_v24  ;;  %v2226_v63 = vcombine.high %v2225_v16, %v2225_v16  ;;  %v1105_v42 = vmin.f32 %v1104_v47, %v923_v49 }
  0xfa   :  { %v956_v9 = vadd.f32 %v955_v13, %v954_v62  ;;  %v1129_v53 = vmin.f32 %v1128_v56, %v930_v19  ;;  %v937_v52 = vadd.f32 %v936_v43, %v935_v0  ;;  %v960_v35 = vrot.slane %v959_v4, 4 }
  0xfb   :  { %v966_v34 = vsel %vm342_vm0, %v2226_v63, 0.0  ;;  %v944_v3 = vadd.f32 %v943_v58, %v942_v45  ;;  %v950_v60 = vrot.slane %v949_v36, 1  ;;  %v973_v2 = vsel %vm342_vm0, %v2227_v38, 0.0  ;;  %v2231_v45 = vld [vmem:[#allocation28_spill] sm:$0xff] }
  0xfc   :  { %v957_v51 = vrot.slane %v956_v9, 1  ;;  %v967_v25 = vrot.slane %v966_v34, 4  ;;  %v1106_v15 = vmin.f32 %v1105_v42, %v937_v52  ;;  %v2228_v22 = vcombine.high %v2227_v38, %v2227_v38 }
  0xfd   :  { %v1130_v40 = vmin.f32 %v1129_v53, %v944_v3  ;;  %v951_v18 = vadd.f32 %v950_v60, %v949_v36  ;;  %v961_v17 = vadd.f32 %v960_v35, %v959_v4  ;;  %v974_v1 = vrot.slane %v973_v2, 4 }
  0xfe   :  { %v980_v44 = vsel %vm342_vm0, %v2228_v22, 0.0  ;;  %v958_v30 = vadd.f32 %v957_v51, %v956_v9  ;;  %v968_v23 = vadd.f32 %v967_v25, %v966_v34  ;;  %v987_v21 = vsel %vm342_vm0, %v2229_v26, 0.0 }
  0xff   :  { %v981_v10 = vrot.slane %v980_v44, 4  ;;  %v2230_v11 = vcombine.high %v2229_v26, %v2229_v26  ;;  %v1107_v27 = vmin.f32 %v1106_v15, %v951_v18  ;;  %v962_v61 = vrot.slane %v961_v17, 2 }
 0x100   :  { %v1131_v31 = vmin.f32 %v1130_v40, %v958_v30  ;;  %v969_v14 = vrot.slane %v968_v23, 2  ;;  %v975_v59 = vadd.f32 %v974_v1, %v973_v2  ;;  %v988_v62 = vrot.slane %v987_v21, 4 }
 0x101   :  { %v994_v5 = vsel %vm342_vm0, %v2230_v11, 0.0  ;;  %v982_v24 = vadd.f32 %v981_v10, %v980_v44  ;;  %v963_v55 = vadd.f32 %v962_v61, %v961_v17  ;;  %v1001_v47 = vsel %vm342_vm0, %v2231_v45, 0.0  ;;  %v2233_v10 = vld [vmem:[#allocation29_spill] sm:$0xff] }
 0x102   :  { %v995_v20 = vrot.slane %v994_v5, 4  ;;  %v970_v0 = vadd.f32 %v969_v14, %v968_v23  ;;  %v2232_v56 = vcombine.high %v2231_v45, %v2231_v45  ;;  %v976_v13 = vrot.slane %v975_v59, 2 }
 0x103   :  { %v983_v49 = vrot.slane %v982_v24, 2  ;;  %v989_v19 = vadd.f32 %v988_v62, %v987_v21  ;;  %v964_v58 = vrot.slane %v963_v55, 1  ;;  %v1002_v9 = vrot.slane %v1001_v47, 4 }
 0x104   :  { %v1008_v48 = vsel %vm342_vm0, %v2232_v56, 0.0  ;;  %v996_v43 = vadd.f32 %v995_v20, %v994_v5  ;;  %v971_v36 = vrot.slane %v970_v0, 1  ;;  %v977_v4 = vadd.f32 %v976_v13, %v975_v59 }
 0x105   :  { %v1009_v16 = vrot.slane %v1008_v48, 4  ;;  %v984_v63 = vadd.f32 %v983_v49, %v982_v24  ;;  %v990_v34 = vrot.slane %v989_v19, 2  ;;  %v965_v53 = vadd.f32 %v964_v58, %v963_v55 }
 0x106   :  { %v997_v42 = vrot.slane %v996_v43, 2  ;;  %v972_v52 = vadd.f32 %v971_v36, %v970_v0  ;;  %v1003_v3 = vadd.f32 %v1002_v9, %v1001_v47  ;;  %v978_v51 = vrot.slane %v977_v4, 1  ;;  %v2235_v0 = vld [vmem:[#allocation30_spill] sm:$0xff] }
 0x107   :  { %v1010_v60 = vadd.f32 %v1009_v16, %v1008_v48  ;;  %v985_v35 = vrot.slane %v984_v63, 1  ;;  %v991_v25 = vadd.f32 %v990_v34, %v989_v19  ;;  %v1108_v40 = vmin.f32 %v1107_v27, %v965_v53 }
 0x108   :  { %v998_v15 = vadd.f32 %v997_v42, %v996_v43  ;;  %v1132_v38 = vmin.f32 %v1131_v31, %v972_v52  ;;  %v1004_v2 = vrot.slane %v1003_v3, 2  ;;  %v979_v44 = vadd.f32 %v978_v51, %v977_v4 }
 0x109   :  { %v1011_v22 = vrot.slane %v1010_v60, 2  ;;  %v986_v18 = vadd.f32 %v985_v35, %v984_v63  ;;  %v992_v30 = vrot.slane %v991_v25, 1  ;;  %v1015_v26 = vsel %vm342_vm0, %v2233_v10, 0.0 }
 0x10a   :  { %v999_v17 = vrot.slane %v998_v15, 1  ;;  %v1005_v23 = vadd.f32 %v1004_v2, %v1003_v3  ;;  %v2234_v21 = vcombine.high %v2233_v10, %v2233_v10  ;;  %v1109_v5 = vmin.f32 %v1108_v40, %v979_v44 }
 0x10b   :  { %v1012_v1 = vadd.f32 %v1011_v22, %v1010_v60  ;;  %v1133_v61 = vmin.f32 %v1132_v38, %v986_v18  ;;  %v993_v27 = vadd.f32 %v992_v30, %v991_v25  ;;  %v1016_v24 = vrot.slane %v1015_v26, 4 }
 0x10c   :  { %v1022_v11 = vsel %vm342_vm0, %v2234_v21, 0.0  ;;  %v1000_v31 = vadd.f32 %v999_v17, %v998_v15  ;;  %v1006_v14 = vrot.slane %v1005_v23, 1  ;;  %v1089_v20 = vmin.f32 %v1088_v7, %v1927_v28 }
 0x10d   :  { %v1013_v59 = vrot.slane %v1012_v1, 1  ;;  %v1023_v62 = vrot.slane %v1022_v11, 4  ;;  %v712_v55 = vrot.slane %v1939_v46, 1  ;;  %v1029_v45 = vsel %vm342_vm0, %v2235_v0, 0.0 }
 0x10e   :  { %v2236_v47 = vcombine.high %v2235_v0, %v2235_v0  ;;  %v699_v48 = vadd.f32 %v698_v50, %v1907_v8  ;;  %v719_v13 = vrot.slane %v1941_v6, 1  ;;  %v1017_v49 = vadd.f32 %v1016_v24, %v1015_v26 }
 0x10f   :  { %v1024_v19 = vadd.f32 %v1023_v62, %v1022_v11  ;;  %v1110_v29 = vmin.f32 %v1109_v5, %v993_v27  ;;  %v1134_v37 = vmin.f32 %v1133_v61, %v1000_v31  ;;  %v1030_v7 = vrot.slane %v1029_v45, 4 }
 0x110   :  { %v1036_v56 = vsel %vm342_vm0, %v2236_v47, 0.0  ;;  %v1007_v43 = vadd.f32 %v1006_v14, %v1005_v23  ;;  %v1014_v58 = vadd.f32 %v1013_v59, %v1012_v1  ;;  %v1018_v36 = vrot.slane %v1017_v49, 2 }
 0x111   :  { %v1037_v28 = vrot.slane %v1036_v56, 4  ;;  %v1025_v9 = vrot.slane %v1024_v19, 2  ;;  %v706_v16 = vadd.f32 %v705_v32, %v1914_v39  ;;  %v713_v4 = vadd.f32 %v712_v55, %v1939_v46 }
 0x112   :  { %v1031_v63 = vadd.f32 %v1030_v7, %v1029_v45  ;;  %v720_v50 = vadd.f32 %v719_v13, %v1941_v6  ;;  %v1019_v34 = vadd.f32 %v1018_v36, %v1017_v49  ;;  %v1043_v53 = vmin.f32 %v1912_v57, %v1920_v54 }
 0x113   :  { %v1038_v8 = vadd.f32 %v1037_v28, %v1036_v56  ;;  %v1026_v42 = vadd.f32 %v1025_v9, %v1024_v19  ;;  %v1067_v60 = vmin.f32 %v1917_v41, %v1923_v33  ;;  %v1111_v51 = vmin.f32 %v1110_v29, %v1007_v43 }
 0x114   :  { %v1032_v52 = vrot.slane %v1031_v63, 2  ;;  %v1135_v35 = vmin.f32 %v1134_v37, %v1014_v58  ;;  %v1020_v25 = vrot.slane %v1019_v34, 1  ;;  %v1272_v15 = vmov 1983009808  }
 0x115   :  { %v1039_v3 = vrot.slane %v1038_v8, 2  ;;  %v1027_v39 = vrot.slane %v1026_v42, 1  ;;  %v1145_v40 = vunpack.c.l.s4 %v1272_v15  ;;  %v1147_v38 = vlaneseq }
 0x116   :  { %v1033_v32 = vadd.f32 %v1032_v52, %v1031_v63  ;;  %v1021_v6 = vadd.f32 %v1020_v25, %v1019_v34  ;;  %v1066_v57 = vmin.f32 %v1930_v12, %v1043_v53  ;;  %v1090_v54 = vmin.f32 %v1089_v20, %v1067_v60 }
 0x117   :  { %v1040_v46 = vadd.f32 %v1039_v3, %v1038_v8  ;;  %v1028_v2 = vadd.f32 %v1027_v39, %v1026_v42  ;;  %v1091_v17 = vmin.f32 %v699_v48, %v713_v4  ;;  %v1115_v41 = vmin.f32 %v706_v16, %v720_v50 }
 0x118   :  { %v1034_v22 = vrot.slane %v1033_v32, 1  ;;  %v1112_v18 = vmin.f32 %v1111_v51, %v1021_v6  ;;  %v1146_v1 = vunpack.c.0.s8 %v1145_v40  ;;  %v1148_v10 = vshrl.u32 %v1147_v38, 7 }
 0x119   :  { %v1041_v44 = vrot.slane %v1040_v46, 1  ;;  %v1136_v30 = vmin.f32 %v1135_v35, %v1028_v2  ;;  %v1143_v61 = vcombine.low %v1066_v57, %v1090_v54 }
 0x11a   :  { %v1035_v33 = vadd.f32 %v1034_v22, %v1033_v32  ;;  %v1149_v27 = vsub.s32 %v1146_v1, %v1148_v10 }
 0x11b   :  { %v1042_v23 = vadd.f32 %v1041_v44, %v1040_v46 }
 0x11c   :  { %v1113_v26 = vmin.f32 %v1112_v18, %v1035_v33  ;;  %v1150_v14 = vrot.slane %v1143_v61, %v1149_v27 }
 0x11d   :  { %v1137_v21 = vmin.f32 %v1136_v30, %v1042_v23 }
 0x11e   :  { %v1114_v11 = vmin.f32 %v1113_v26, %v1091_v17 }
 0x11f   :  { %v1138_v5 = vmin.f32 %v1137_v21, %v1115_v41 }
 0x121   :  { %v1151_v31 = vcombine.low %v1114_v11, %v1138_v5 }
 0x123   :  { %v1158_v59 = vrot.slane %v1151_v31, %v1149_v27 }
 0x125   :  { %v1163_v12 = vrot.slane %v1158_v59, 7 }
 0x127   :  { %v1165_v24 = vsel %vm1164_vm1, %v1163_v12, %v1150_v14 }
 0x128   :  { %v1167_v62 = vsel %vm1166_vm2, %v1163_v12, %v1165_v24 }
 0x129   :  { %v1169_v20 = vsel %vm1168_vm3, %v1163_v12, %v1167_v62 }
 0x12a   :  { %v1171_v55 = vsel %vm1170_vm4, %v1163_v12, %v1169_v20 }
 0x12b   :  { %1173 = vst [vmem:[#allocation7] sm:$0xf] %v1171_v55 }
 0x12c   :  { %1251 = shalt.err (!%p1248_p6)
}
 0x12d   :  { %s1252_s10 = scalar_lea.hbm %s2102_s2, 64 }
 0x12e   :  { %p1253_p7 = scmp.ne.s32.totalorder %s2102_s2, %s1252_s10  ;;  %p1256_p8 = scmp.lt.u32.totalorder %s1252_s10, %s2102_s2 }
 0x130   :  { %p1258_p9 = pnand %p1256_p8, %p1253_p7 }
 0x132   :  { %1261 = shalt.err (!%p1258_p9)
}
 0x133   :  { %1183 = dma.vmem_to_hbm [thread:$0]  %s1181_s6, 64, %s2102_s2, [#allocation4]  }
 0x134   :  { %1266 = dma.done.wait [#allocation4], 64  }
 0x135   :  { %1267 = vsyncadd [#allocation4], 4294967232 }
 0x136   :  { %1187 = vsyncpa [#allocation3], 1 }
 0x137   :  { %1188 = vsyncpa [#allocation6], 1 }
 0x138   :  { %1189 = vsyncpa [#allocation4], 1 }

</bundles_post_ra>
